<compile_context>
chip_gen: v7x
topology: tpu7x:2x2x1
jax: 0.10.0
libtpu: 0.0.40
codegen_flags: <defaults>
</compile_context>

<pallas_src>
import functools

import jax
import jax.numpy as jnp
from jax.experimental import pallas as pl
from jax.experimental.pallas import tpu as pltpu

# ---- hyperparameters (mirror the PyTorch defaults, small shapes) -----------
DIM_PROJ = 32          # base_encoder.projhead_dim
N_PROTO = 16           # base_encoder.nmb_prototypes
T_TEMP = 0.07
EPSILON = 0.05
SINKHORN_ITERS = 10


# --------------------------- fused Pallas kernel -----------------------------
def swav_fused_kernel(x1_ref, x2_ref, wf_ref, o_ref, *, n_iters, inv_t,
                      inv_eps, inv_b, inv_p):
    """Fused pooling + (folded) prototype scores + SwAV contrastive loss.

    x1_ref: (B, C, S) f32  query view, spatial flattened onto the lane axis
    x2_ref: (B, C, S) f32  key view
    wf_ref: (C, P)    f32  (w_enc @ w_proto) / S   -- folded projection
    o_ref : (1, 1)    f32  scalar loss
    """
    wf = wf_ref[...]                                               # (C, P)

    # Spatial mean as an in-kernel lane reduce (the 1/S is folded into wf).
    pooled_q = jnp.sum(x1_ref[...], axis=-1)                       # (B, C)
    pooled_k = jnp.sum(x2_ref[...], axis=-1)                       # (B, C)

    # Encoder projection + prototype Linear folded into one tiny MXU matmul.
    s_q = jnp.dot(pooled_q, wf, preferred_element_type=jnp.float32)   # (B, P)
    s_k = jnp.dot(pooled_k, wf, preferred_element_type=jnp.float32)   # (B, P)

    def recip_fast(v):
        # Bare EUP reciprocal: Sinkhorn renormalization self-corrects the
        # per-row / per-column scale error of every iteration but the last.
        return pl.reciprocal(v, approx=True)

    def recip_acc(v):
        # One Newton step on top of the EUP estimate (error ~ eps^2); only the
        # final iteration's errors survive into Q, so refine only there.
        r = pl.reciprocal(v, approx=True)
        return r * (2.0 - v * r)

    def sinkhorn(s):
        # Per-view global max subtraction: keeps exp(score/0.05) finite and
        # cancels exactly at the first total-sum normalization.
        smax = jnp.max(jnp.max(s, axis=1, keepdims=True),
                       axis=0, keepdims=True)                      # (1, 1)
        q = jnp.exp((s - smax) * inv_eps)                          # (B, P)
        tot = jnp.sum(jnp.sum(q, axis=1, keepdims=True),
                      axis=0, keepdims=True)                       # (1, 1)
        q = q * recip_fast(tot)
        for it in range(n_iters):
            rec = recip_acc if it == n_iters - 1 else recip_fast
            # rows of Q^T (per prototype): sum over batch, then /K(=P)
            q = q * (rec(jnp.sum(q, axis=0, keepdims=True)) * inv_p)
            # cols of Q^T (per sample): sum over prototypes, then /B
            q = q * (rec(jnp.sum(q, axis=1, keepdims=True)) * inv_b)
        return q   # trailing `Q *= B` of the reference folded into loss scale

    def log_softmax(s):
        z = s * inv_t
        z = z - jnp.max(z, axis=1, keepdims=True)
        return z - jnp.log(jnp.sum(jnp.exp(z), axis=1, keepdims=True))

    # Two independent per-view chains: no stack/slice relayouts, and the two
    # serial Sinkhorn dependency chains overlap via ILP.
    q_q = sinkhorn(s_q)
    q_k = sinkhorn(s_k)
    lp_q = log_softmax(s_q)
    lp_k = log_softmax(s_k)

    # loss = -mean_b sum_p (q_q*p_k + q_k*p_t) / 2 ; with `Q *= B` and the 1/B
    # of the mean cancelling, this is -0.5 * sum(cross).
    cross = q_q * lp_k + q_k * lp_q                                # (B, P)
    tot_c = jnp.sum(jnp.sum(cross, axis=1, keepdims=True),
                    axis=0, keepdims=True)                         # (1, 1)
    o_ref[...] = -0.5 * tot_c


# ------------------------------ wrappers -------------------------------------
def pallas_swav_loss(x1, x2, w_fold, b):
    _, c, s = x1.shape
    p = w_fold.shape[1]
    kernel = functools.partial(
        swav_fused_kernel,
        n_iters=SINKHORN_ITERS,
        inv_t=1.0 / T_TEMP,
        inv_eps=1.0 / EPSILON,
        inv_b=1.0 / b,
        inv_p=1.0 / p,
    )
    # Advisory cost hint so XLA can schedule/overlap the surrounding host-side
    # reshapes/casts instead of serializing around an opaque custom call.
    flops = (2 * b * c * s                              # spatial sums, 2 views
             + 2 * (2 * b * c * p)                      # folded projection
             + 2 * (4 * SINKHORN_ITERS + 10) * b * p)   # sinkhorn+softmax+loss
    transcendentals = (2 * 2 * b * p                    # exps (sinkhorn+softmax)
                       + 2 * b                          # logs
                       + 2 * (2 * SINKHORN_ITERS + 1))  # EUP reciprocals
    bytes_accessed = (x1.size + x2.size + w_fold.size + 1) * 4

    out = pl.pallas_call(
        kernel,
        out_shape=jax.ShapeDtypeStruct((1, 1), jnp.float32),
        # Single invocation, everything VMEM-resident -> no grid, no pointless
        # double-buffering at these tiny shapes.
        # TODO(synk): if 2B*C*S*4B ever approaches VMEM (v7x: 64 MiB physical /
        # 32 MiB default scoped; v5e: 16 MiB default scoped), split into a
        # batch-tiled ("parallel"-grid) scoring kernel plus a tiny loss kernel
        # (Sinkhorn couples the whole batch), and set vmem_limit_bytes via
        # pltpu.CompilerParams explicitly.
        in_specs=[
            pl.BlockSpec(memory_space=pltpu.MemorySpace.VMEM),
            pl.BlockSpec(memory_space=pltpu.MemorySpace.VMEM),
            pl.BlockSpec(memory_space=pltpu.MemorySpace.VMEM),
        ],
        out_specs=pl.BlockSpec(memory_space=pltpu.MemorySpace.VMEM),
        cost_estimate=pl.CostEstimate(
            flops=flops,
            transcendentals=transcendentals,
            bytes_accessed=bytes_accessed,
        ),
    )(x1, x2, w_fold)
    return out[0, 0]


def swav_forward(x1, x2, w_enc, w_proto):
    """Full SWAV_TcssAMR.forward: returns the scalar contrastive loss."""
    B, C, H, W = x1.shape
    S = H * W
    # Free, contiguous host-side reshapes (no concatenate, no extra HBM copy).
    x1r = x1.reshape(B, C, S).astype(jnp.float32)
    x2r = x2.reshape(B, C, S).astype(jnp.float32)
    # Fold encoder projection, prototype Linear and the spatial mean (1/S)
    # into a single tiny (C, P) weight:  score = mean_s(x) @ w_enc @ w_proto.
    # TODO(synk): this algebraic fold is only valid for the linear stand-in
    # encoder; a real nonlinear base_encoder would need its own kernel stage.
    w_fold = (w_enc.astype(jnp.float32) @ w_proto.astype(jnp.float32)) * (1.0 / S)
    return pallas_swav_loss(x1r, x2r, w_fold, B)


# --------------------------- pure-JAX reference -------------------------------
def reference_forward(x1, x2, w_enc, w_proto):
    def enc(x):
        B, C, H, W = x.shape
        pooled = jnp.mean(x.reshape(B, C, H * W), axis=2)
        return pooled @ w_enc

    def sinkhorn(scores):
        Q = jnp.exp(scores / EPSILON).T          # (P, B)
        Bn = Q.shape[1]
        Kn = Q.shape[0]
        Q = Q / jnp.sum(Q)
        for _ in range(SINKHORN_ITERS):
            Q = Q / jnp.sum(Q, axis=1, keepdims=True)
            Q = Q / Kn
            Q = Q / jnp.sum(Q, axis=0, keepdims=True)
            Q = Q / Bn
        Q = Q * Bn
        return Q.T

    def log_softmax(s):
        z = s / T_TEMP
        z = z - jnp.max(z, axis=1, keepdims=True)
        return z - jnp.log(jnp.sum(jnp.exp(z), axis=1, keepdims=True))

    cq, ck = enc(x1), enc(x2)
    sq, sk = cq @ w_proto, ck @ w_proto
    q_q, q_k = sinkhorn(sq), sinkhorn(sk)
    p_t, p_k = log_softmax(sq), log_softmax(sk)
    return -jnp.mean(jnp.sum(q_q * p_k + q_k * p_t, axis=1)) / 2.0


# ------------------------------- main ----------------------------------------
if __name__ == "__main__":
    key = jax.random.PRNGKey(0)
    k1, k2, k3, k4 = jax.random.split(key, 4)

    B, C, H, W = 2, 4, 16, 16
    x1 = jax.random.normal(k1, (B, C, H, W), dtype=jnp.float32)
    x2 = jax.random.normal(k2, (B, C, H, W), dtype=jnp.float32)

    # Deterministic parameter init (synthetic; not a checkpoint load).
    w_enc = 0.1 * jax.random.normal(k3, (C, DIM_PROJ), dtype=jnp.float32)
    # prototypes Linear(projhead_dim -> nmb_prototypes, bias=False); stored
    # pre-transposed as (D, P) so score = code @ w_proto.
    w_proto = 0.1 * jax.random.normal(k4, (DIM_PROJ, N_PROTO),
                                      dtype=jnp.float32)

    loss = swav_forward(x1, x2, w_enc, w_proto)
    loss = jax.block_until_ready(loss)

    ref = jax.block_until_ready(reference_forward(x1, x2, w_enc, w_proto))
    assert jnp.isfinite(loss), "loss is not finite"
    assert abs(float(loss) - float(ref)) < 1e-3 * max(1.0, abs(float(ref))), (
        float(loss), float(ref))

    print("KERNEL_OK")
</pallas_src>

<mosaic_0001>
module attributes {stable_mosaic.version = 11 : i64} {
  func.func @swav_fused_kernel(%arg0: memref<2x4x256xf32, #tpu.memory_space<vmem>>, %arg1: memref<2x4x256xf32, #tpu.memory_space<vmem>>, %arg2: memref<4x16xf32, #tpu.memory_space<vmem>>, %arg3: memref<1x1xf32, #tpu.memory_space<vmem>>) attributes {dimension_semantics = [], scalar_prefetch = 0 : i64, scratch_operands = 0 : i64, tpu.core_type = #tpu.core_type<tc>} {
    %c0 = arith.constant 0 : index
    %c0_0 = arith.constant 0 : index
    %0 = vector.load %arg2[%c0, %c0_0] : memref<4x16xf32, #tpu.memory_space<vmem>>, vector<4x16xf32>
    %c0_1 = arith.constant 0 : index
    %c0_2 = arith.constant 0 : index
    %c0_3 = arith.constant 0 : index
    %1 = vector.load %arg0[%c0_1, %c0_2, %c0_3] : memref<2x4x256xf32, #tpu.memory_space<vmem>>, vector<2x4x256xf32>
    %cst = arith.constant dense<0.000000e+00> : vector<2x4xf32>
    %2 = vector.multi_reduction <add>, %1, %cst [2] : vector<2x4x256xf32> to vector<2x4xf32>
    %c0_4 = arith.constant 0 : index
    %c0_5 = arith.constant 0 : index
    %c0_6 = arith.constant 0 : index
    %3 = vector.load %arg1[%c0_4, %c0_5, %c0_6] : memref<2x4x256xf32, #tpu.memory_space<vmem>>, vector<2x4x256xf32>
    %cst_7 = arith.constant dense<0.000000e+00> : vector<2x4xf32>
    %4 = vector.multi_reduction <add>, %3, %cst_7 [2] : vector<2x4x256xf32> to vector<2x4xf32>
    %cst_8 = arith.constant dense<0.000000e+00> : vector<2x16xf32>
    %5 = tpu.matmul %2, %0, %cst_8 {dimension_numbers = #tpu.dot_dimension_numbers<[1], [0], [0], [1], [0, 0, 1, 1], [], []>} : vector<2x4xf32>, vector<4x16xf32>, vector<2x16xf32> -> vector<2x16xf32>
    %cst_9 = arith.constant dense<0.000000e+00> : vector<2x16xf32>
    %6 = tpu.matmul %4, %0, %cst_9 {dimension_numbers = #tpu.dot_dimension_numbers<[1], [0], [0], [1], [0, 0, 1, 1], [], []>} : vector<2x4xf32>, vector<4x16xf32>, vector<2x16xf32> -> vector<2x16xf32>
    %cst_10 = arith.constant dense<0xFF800000> : vector<2xf32>
    %7 = vector.multi_reduction <maximumf>, %5, %cst_10 [1] : vector<2x16xf32> to vector<2xf32>
    %8 = vector.shape_cast %7 : vector<2xf32> to vector<2x1xf32>
    %cst_11 = arith.constant dense<0xFF800000> : vector<1xf32>
    %9 = vector.multi_reduction <maximumf>, %8, %cst_11 [0] : vector<2x1xf32> to vector<1xf32>
    %10 = vector.shape_cast %9 : vector<1xf32> to vector<1x1xf32>
    %11 = vector.broadcast %10 : vector<1x1xf32> to vector<2x16xf32>
    %12 = arith.subf %5, %11 : vector<2x16xf32>
    %cst_12 = arith.constant 2.000000e+01 : f32
    %13 = vector.broadcast %cst_12 : f32 to vector<2x16xf32>
    %14 = arith.mulf %12, %13 : vector<2x16xf32>
    %15 = math.exp %14 : vector<2x16xf32>
    %cst_13 = arith.constant dense<0.000000e+00> : vector<2xf32>
    %16 = vector.multi_reduction <add>, %15, %cst_13 [1] : vector<2x16xf32> to vector<2xf32>
    %17 = vector.shape_cast %16 : vector<2xf32> to vector<2x1xf32>
    %cst_14 = arith.constant dense<0.000000e+00> : vector<1xf32>
    %18 = vector.multi_reduction <add>, %17, %cst_14 [0] : vector<2x1xf32> to vector<1xf32>
    %19 = vector.shape_cast %18 : vector<1xf32> to vector<1x1xf32>
    %20 = tpu.reciprocal %19 {approx = true} : vector<1x1xf32> -> vector<1x1xf32>
    %21 = vector.broadcast %20 : vector<1x1xf32> to vector<2x16xf32>
    %22 = arith.mulf %15, %21 : vector<2x16xf32>
    %cst_15 = arith.constant dense<0.000000e+00> : vector<16xf32>
    %23 = vector.multi_reduction <add>, %22, %cst_15 [0] : vector<2x16xf32> to vector<16xf32>
    %24 = vector.shape_cast %23 : vector<16xf32> to vector<1x16xf32>
    %25 = tpu.reciprocal %24 {approx = true} : vector<1x16xf32> -> vector<1x16xf32>
    %cst_16 = arith.constant 6.250000e-02 : f32
    %26 = vector.broadcast %cst_16 : f32 to vector<1x16xf32>
    %27 = arith.mulf %25, %26 : vector<1x16xf32>
    %28 = vector.broadcast %27 : vector<1x16xf32> to vector<2x16xf32>
    %29 = arith.mulf %22, %28 : vector<2x16xf32>
    %cst_17 = arith.constant dense<0.000000e+00> : vector<2xf32>
    %30 = vector.multi_reduction <add>, %29, %cst_17 [1] : vector<2x16xf32> to vector<2xf32>
    %31 = vector.shape_cast %30 : vector<2xf32> to vector<2x1xf32>
    %32 = tpu.reciprocal %31 {approx = true} : vector<2x1xf32> -> vector<2x1xf32>
    %cst_18 = arith.constant 5.000000e-01 : f32
    %33 = vector.broadcast %cst_18 : f32 to vector<2x1xf32>
    %34 = arith.mulf %32, %33 : vector<2x1xf32>
    %35 = vector.broadcast %34 : vector<2x1xf32> to vector<2x16xf32>
    %36 = arith.mulf %29, %35 : vector<2x16xf32>
    %cst_19 = arith.constant dense<0.000000e+00> : vector<16xf32>
    %37 = vector.multi_reduction <add>, %36, %cst_19 [0] : vector<2x16xf32> to vector<16xf32>
    %38 = vector.shape_cast %37 : vector<16xf32> to vector<1x16xf32>
    %39 = tpu.reciprocal %38 {approx = true} : vector<1x16xf32> -> vector<1x16xf32>
    %cst_20 = arith.constant 6.250000e-02 : f32
    %40 = vector.broadcast %cst_20 : f32 to vector<1x16xf32>
    %41 = arith.mulf %39, %40 : vector<1x16xf32>
    %42 = vector.broadcast %41 : vector<1x16xf32> to vector<2x16xf32>
    %43 = arith.mulf %36, %42 : vector<2x16xf32>
    %cst_21 = arith.constant dense<0.000000e+00> : vector<2xf32>
    %44 = vector.multi_reduction <add>, %43, %cst_21 [1] : vector<2x16xf32> to vector<2xf32>
    %45 = vector.shape_cast %44 : vector<2xf32> to vector<2x1xf32>
    %46 = tpu.reciprocal %45 {approx = true} : vector<2x1xf32> -> vector<2x1xf32>
    %cst_22 = arith.constant 5.000000e-01 : f32
    %47 = vector.broadcast %cst_22 : f32 to vector<2x1xf32>
    %48 = arith.mulf %46, %47 : vector<2x1xf32>
    %49 = vector.broadcast %48 : vector<2x1xf32> to vector<2x16xf32>
    %50 = arith.mulf %43, %49 : vector<2x16xf32>
    %cst_23 = arith.constant dense<0.000000e+00> : vector<16xf32>
    %51 = vector.multi_reduction <add>, %50, %cst_23 [0] : vector<2x16xf32> to vector<16xf32>
    %52 = vector.shape_cast %51 : vector<16xf32> to vector<1x16xf32>
    %53 = tpu.reciprocal %52 {approx = true} : vector<1x16xf32> -> vector<1x16xf32>
    %cst_24 = arith.constant 6.250000e-02 : f32
    %54 = vector.broadcast %cst_24 : f32 to vector<1x16xf32>
    %55 = arith.mulf %53, %54 : vector<1x16xf32>
    %56 = vector.broadcast %55 : vector<1x16xf32> to vector<2x16xf32>
    %57 = arith.mulf %50, %56 : vector<2x16xf32>
    %cst_25 = arith.constant dense<0.000000e+00> : vector<2xf32>
    %58 = vector.multi_reduction <add>, %57, %cst_25 [1] : vector<2x16xf32> to vector<2xf32>
    %59 = vector.shape_cast %58 : vector<2xf32> to vector<2x1xf32>
    %60 = tpu.reciprocal %59 {approx = true} : vector<2x1xf32> -> vector<2x1xf32>
    %cst_26 = arith.constant 5.000000e-01 : f32
    %61 = vector.broadcast %cst_26 : f32 to vector<2x1xf32>
    %62 = arith.mulf %60, %61 : vector<2x1xf32>
    %63 = vector.broadcast %62 : vector<2x1xf32> to vector<2x16xf32>
    %64 = arith.mulf %57, %63 : vector<2x16xf32>
    %cst_27 = arith.constant dense<0.000000e+00> : vector<16xf32>
    %65 = vector.multi_reduction <add>, %64, %cst_27 [0] : vector<2x16xf32> to vector<16xf32>
    %66 = vector.shape_cast %65 : vector<16xf32> to vector<1x16xf32>
    %67 = tpu.reciprocal %66 {approx = true} : vector<1x16xf32> -> vector<1x16xf32>
    %cst_28 = arith.constant 6.250000e-02 : f32
    %68 = vector.broadcast %cst_28 : f32 to vector<1x16xf32>
    %69 = arith.mulf %67, %68 : vector<1x16xf32>
    %70 = vector.broadcast %69 : vector<1x16xf32> to vector<2x16xf32>
    %71 = arith.mulf %64, %70 : vector<2x16xf32>
    %cst_29 = arith.constant dense<0.000000e+00> : vector<2xf32>
    %72 = vector.multi_reduction <add>, %71, %cst_29 [1] : vector<2x16xf32> to vector<2xf32>
    %73 = vector.shape_cast %72 : vector<2xf32> to vector<2x1xf32>
    %74 = tpu.reciprocal %73 {approx = true} : vector<2x1xf32> -> vector<2x1xf32>
    %cst_30 = arith.constant 5.000000e-01 : f32
    %75 = vector.broadcast %cst_30 : f32 to vector<2x1xf32>
    %76 = arith.mulf %74, %75 : vector<2x1xf32>
    %77 = vector.broadcast %76 : vector<2x1xf32> to vector<2x16xf32>
    %78 = arith.mulf %71, %77 : vector<2x16xf32>
    %cst_31 = arith.constant dense<0.000000e+00> : vector<16xf32>
    %79 = vector.multi_reduction <add>, %78, %cst_31 [0] : vector<2x16xf32> to vector<16xf32>
    %80 = vector.shape_cast %79 : vector<16xf32> to vector<1x16xf32>
    %81 = tpu.reciprocal %80 {approx = true} : vector<1x16xf32> -> vector<1x16xf32>
    %cst_32 = arith.constant 6.250000e-02 : f32
    %82 = vector.broadcast %cst_32 : f32 to vector<1x16xf32>
    %83 = arith.mulf %81, %82 : vector<1x16xf32>
    %84 = vector.broadcast %83 : vector<1x16xf32> to vector<2x16xf32>
    %85 = arith.mulf %78, %84 : vector<2x16xf32>
    %cst_33 = arith.constant dense<0.000000e+00> : vector<2xf32>
    %86 = vector.multi_reduction <add>, %85, %cst_33 [1] : vector<2x16xf32> to vector<2xf32>
    %87 = vector.shape_cast %86 : vector<2xf32> to vector<2x1xf32>
    %88 = tpu.reciprocal %87 {approx = true} : vector<2x1xf32> -> vector<2x1xf32>
    %cst_34 = arith.constant 5.000000e-01 : f32
    %89 = vector.broadcast %cst_34 : f32 to vector<2x1xf32>
    %90 = arith.mulf %88, %89 : vector<2x1xf32>
    %91 = vector.broadcast %90 : vector<2x1xf32> to vector<2x16xf32>
    %92 = arith.mulf %85, %91 : vector<2x16xf32>
    %cst_35 = arith.constant dense<0.000000e+00> : vector<16xf32>
    %93 = vector.multi_reduction <add>, %92, %cst_35 [0] : vector<2x16xf32> to vector<16xf32>
    %94 = vector.shape_cast %93 : vector<16xf32> to vector<1x16xf32>
    %95 = tpu.reciprocal %94 {approx = true} : vector<1x16xf32> -> vector<1x16xf32>
    %cst_36 = arith.constant 6.250000e-02 : f32
    %96 = vector.broadcast %cst_36 : f32 to vector<1x16xf32>
    %97 = arith.mulf %95, %96 : vector<1x16xf32>
    %98 = vector.broadcast %97 : vector<1x16xf32> to vector<2x16xf32>
    %99 = arith.mulf %92, %98 : vector<2x16xf32>
    %cst_37 = arith.constant dense<0.000000e+00> : vector<2xf32>
    %100 = vector.multi_reduction <add>, %99, %cst_37 [1] : vector<2x16xf32> to vector<2xf32>
    %101 = vector.shape_cast %100 : vector<2xf32> to vector<2x1xf32>
    %102 = tpu.reciprocal %101 {approx = true} : vector<2x1xf32> -> vector<2x1xf32>
    %cst_38 = arith.constant 5.000000e-01 : f32
    %103 = vector.broadcast %cst_38 : f32 to vector<2x1xf32>
    %104 = arith.mulf %102, %103 : vector<2x1xf32>
    %105 = vector.broadcast %104 : vector<2x1xf32> to vector<2x16xf32>
    %106 = arith.mulf %99, %105 : vector<2x16xf32>
    %cst_39 = arith.constant dense<0.000000e+00> : vector<16xf32>
    %107 = vector.multi_reduction <add>, %106, %cst_39 [0] : vector<2x16xf32> to vector<16xf32>
    %108 = vector.shape_cast %107 : vector<16xf32> to vector<1x16xf32>
    %109 = tpu.reciprocal %108 {approx = true} : vector<1x16xf32> -> vector<1x16xf32>
    %cst_40 = arith.constant 6.250000e-02 : f32
    %110 = vector.broadcast %cst_40 : f32 to vector<1x16xf32>
    %111 = arith.mulf %109, %110 : vector<1x16xf32>
    %112 = vector.broadcast %111 : vector<1x16xf32> to vector<2x16xf32>
    %113 = arith.mulf %106, %112 : vector<2x16xf32>
    %cst_41 = arith.constant dense<0.000000e+00> : vector<2xf32>
    %114 = vector.multi_reduction <add>, %113, %cst_41 [1] : vector<2x16xf32> to vector<2xf32>
    %115 = vector.shape_cast %114 : vector<2xf32> to vector<2x1xf32>
    %116 = tpu.reciprocal %115 {approx = true} : vector<2x1xf32> -> vector<2x1xf32>
    %cst_42 = arith.constant 5.000000e-01 : f32
    %117 = vector.broadcast %cst_42 : f32 to vector<2x1xf32>
    %118 = arith.mulf %116, %117 : vector<2x1xf32>
    %119 = vector.broadcast %118 : vector<2x1xf32> to vector<2x16xf32>
    %120 = arith.mulf %113, %119 : vector<2x16xf32>
    %cst_43 = arith.constant dense<0.000000e+00> : vector<16xf32>
    %121 = vector.multi_reduction <add>, %120, %cst_43 [0] : vector<2x16xf32> to vector<16xf32>
    %122 = vector.shape_cast %121 : vector<16xf32> to vector<1x16xf32>
    %123 = tpu.reciprocal %122 {approx = true} : vector<1x16xf32> -> vector<1x16xf32>
    %cst_44 = arith.constant 6.250000e-02 : f32
    %124 = vector.broadcast %cst_44 : f32 to vector<1x16xf32>
    %125 = arith.mulf %123, %124 : vector<1x16xf32>
    %126 = vector.broadcast %125 : vector<1x16xf32> to vector<2x16xf32>
    %127 = arith.mulf %120, %126 : vector<2x16xf32>
    %cst_45 = arith.constant dense<0.000000e+00> : vector<2xf32>
    %128 = vector.multi_reduction <add>, %127, %cst_45 [1] : vector<2x16xf32> to vector<2xf32>
    %129 = vector.shape_cast %128 : vector<2xf32> to vector<2x1xf32>
    %130 = tpu.reciprocal %129 {approx = true} : vector<2x1xf32> -> vector<2x1xf32>
    %cst_46 = arith.constant 5.000000e-01 : f32
    %131 = vector.broadcast %cst_46 : f32 to vector<2x1xf32>
    %132 = arith.mulf %130, %131 : vector<2x1xf32>
    %133 = vector.broadcast %132 : vector<2x1xf32> to vector<2x16xf32>
    %134 = arith.mulf %127, %133 : vector<2x16xf32>
    %cst_47 = arith.constant dense<0.000000e+00> : vector<16xf32>
    %135 = vector.multi_reduction <add>, %134, %cst_47 [0] : vector<2x16xf32> to vector<16xf32>
    %136 = vector.shape_cast %135 : vector<16xf32> to vector<1x16xf32>
    %137 = tpu.reciprocal %136 {approx = true} : vector<1x16xf32> -> vector<1x16xf32>
    %cst_48 = arith.constant 6.250000e-02 : f32
    %138 = vector.broadcast %cst_48 : f32 to vector<1x16xf32>
    %139 = arith.mulf %137, %138 : vector<1x16xf32>
    %140 = vector.broadcast %139 : vector<1x16xf32> to vector<2x16xf32>
    %141 = arith.mulf %134, %140 : vector<2x16xf32>
    %cst_49 = arith.constant dense<0.000000e+00> : vector<2xf32>
    %142 = vector.multi_reduction <add>, %141, %cst_49 [1] : vector<2x16xf32> to vector<2xf32>
    %143 = vector.shape_cast %142 : vector<2xf32> to vector<2x1xf32>
    %144 = tpu.reciprocal %143 {approx = true} : vector<2x1xf32> -> vector<2x1xf32>
    %cst_50 = arith.constant 5.000000e-01 : f32
    %145 = vector.broadcast %cst_50 : f32 to vector<2x1xf32>
    %146 = arith.mulf %144, %145 : vector<2x1xf32>
    %147 = vector.broadcast %146 : vector<2x1xf32> to vector<2x16xf32>
    %148 = arith.mulf %141, %147 : vector<2x16xf32>
    %cst_51 = arith.constant dense<0.000000e+00> : vector<16xf32>
    %149 = vector.multi_reduction <add>, %148, %cst_51 [0] : vector<2x16xf32> to vector<16xf32>
    %150 = vector.shape_cast %149 : vector<16xf32> to vector<1x16xf32>
    %151 = tpu.reciprocal %150 {approx = true} : vector<1x16xf32> -> vector<1x16xf32>
    %152 = arith.mulf %150, %151 : vector<1x16xf32>
    %cst_52 = arith.constant 2.000000e+00 : f32
    %153 = vector.broadcast %cst_52 : f32 to vector<1x16xf32>
    %154 = arith.subf %153, %152 : vector<1x16xf32>
    %155 = arith.mulf %151, %154 : vector<1x16xf32>
    %cst_53 = arith.constant 6.250000e-02 : f32
    %156 = vector.broadcast %cst_53 : f32 to vector<1x16xf32>
    %157 = arith.mulf %155, %156 : vector<1x16xf32>
    %158 = vector.broadcast %157 : vector<1x16xf32> to vector<2x16xf32>
    %159 = arith.mulf %148, %158 : vector<2x16xf32>
    %cst_54 = arith.constant dense<0.000000e+00> : vector<2xf32>
    %160 = vector.multi_reduction <add>, %159, %cst_54 [1] : vector<2x16xf32> to vector<2xf32>
    %161 = vector.shape_cast %160 : vector<2xf32> to vector<2x1xf32>
    %162 = tpu.reciprocal %161 {approx = true} : vector<2x1xf32> -> vector<2x1xf32>
    %163 = arith.mulf %161, %162 : vector<2x1xf32>
    %cst_55 = arith.constant 2.000000e+00 : f32
    %164 = vector.broadcast %cst_55 : f32 to vector<2x1xf32>
    %165 = arith.subf %164, %163 : vector<2x1xf32>
    %166 = arith.mulf %162, %165 : vector<2x1xf32>
    %cst_56 = arith.constant 5.000000e-01 : f32
    %167 = vector.broadcast %cst_56 : f32 to vector<2x1xf32>
    %168 = arith.mulf %166, %167 : vector<2x1xf32>
    %169 = vector.broadcast %168 : vector<2x1xf32> to vector<2x16xf32>
    %170 = arith.mulf %159, %169 : vector<2x16xf32>
    %cst_57 = arith.constant dense<0xFF800000> : vector<2xf32>
    %171 = vector.multi_reduction <maximumf>, %6, %cst_57 [1] : vector<2x16xf32> to vector<2xf32>
    %172 = vector.shape_cast %171 : vector<2xf32> to vector<2x1xf32>
    %cst_58 = arith.constant dense<0xFF800000> : vector<1xf32>
    %173 = vector.multi_reduction <maximumf>, %172, %cst_58 [0] : vector<2x1xf32> to vector<1xf32>
    %174 = vector.shape_cast %173 : vector<1xf32> to vector<1x1xf32>
    %175 = vector.broadcast %174 : vector<1x1xf32> to vector<2x16xf32>
    %176 = arith.subf %6, %175 : vector<2x16xf32>
    %cst_59 = arith.constant 2.000000e+01 : f32
    %177 = vector.broadcast %cst_59 : f32 to vector<2x16xf32>
    %178 = arith.mulf %176, %177 : vector<2x16xf32>
    %179 = math.exp %178 : vector<2x16xf32>
    %cst_60 = arith.constant dense<0.000000e+00> : vector<2xf32>
    %180 = vector.multi_reduction <add>, %179, %cst_60 [1] : vector<2x16xf32> to vector<2xf32>
    %181 = vector.shape_cast %180 : vector<2xf32> to vector<2x1xf32>
    %cst_61 = arith.constant dense<0.000000e+00> : vector<1xf32>
    %182 = vector.multi_reduction <add>, %181, %cst_61 [0] : vector<2x1xf32> to vector<1xf32>
    %183 = vector.shape_cast %182 : vector<1xf32> to vector<1x1xf32>
    %184 = tpu.reciprocal %183 {approx = true} : vector<1x1xf32> -> vector<1x1xf32>
    %185 = vector.broadcast %184 : vector<1x1xf32> to vector<2x16xf32>
    %186 = arith.mulf %179, %185 : vector<2x16xf32>
    %cst_62 = arith.constant dense<0.000000e+00> : vector<16xf32>
    %187 = vector.multi_reduction <add>, %186, %cst_62 [0] : vector<2x16xf32> to vector<16xf32>
    %188 = vector.shape_cast %187 : vector<16xf32> to vector<1x16xf32>
    %189 = tpu.reciprocal %188 {approx = true} : vector<1x16xf32> -> vector<1x16xf32>
    %cst_63 = arith.constant 6.250000e-02 : f32
    %190 = vector.broadcast %cst_63 : f32 to vector<1x16xf32>
    %191 = arith.mulf %189, %190 : vector<1x16xf32>
    %192 = vector.broadcast %191 : vector<1x16xf32> to vector<2x16xf32>
    %193 = arith.mulf %186, %192 : vector<2x16xf32>
    %cst_64 = arith.constant dense<0.000000e+00> : vector<2xf32>
    %194 = vector.multi_reduction <add>, %193, %cst_64 [1] : vector<2x16xf32> to vector<2xf32>
    %195 = vector.shape_cast %194 : vector<2xf32> to vector<2x1xf32>
    %196 = tpu.reciprocal %195 {approx = true} : vector<2x1xf32> -> vector<2x1xf32>
    %cst_65 = arith.constant 5.000000e-01 : f32
    %197 = vector.broadcast %cst_65 : f32 to vector<2x1xf32>
    %198 = arith.mulf %196, %197 : vector<2x1xf32>
    %199 = vector.broadcast %198 : vector<2x1xf32> to vector<2x16xf32>
    %200 = arith.mulf %193, %199 : vector<2x16xf32>
    %cst_66 = arith.constant dense<0.000000e+00> : vector<16xf32>
    %201 = vector.multi_reduction <add>, %200, %cst_66 [0] : vector<2x16xf32> to vector<16xf32>
    %202 = vector.shape_cast %201 : vector<16xf32> to vector<1x16xf32>
    %203 = tpu.reciprocal %202 {approx = true} : vector<1x16xf32> -> vector<1x16xf32>
    %cst_67 = arith.constant 6.250000e-02 : f32
    %204 = vector.broadcast %cst_67 : f32 to vector<1x16xf32>
    %205 = arith.mulf %203, %204 : vector<1x16xf32>
    %206 = vector.broadcast %205 : vector<1x16xf32> to vector<2x16xf32>
    %207 = arith.mulf %200, %206 : vector<2x16xf32>
    %cst_68 = arith.constant dense<0.000000e+00> : vector<2xf32>
    %208 = vector.multi_reduction <add>, %207, %cst_68 [1] : vector<2x16xf32> to vector<2xf32>
    %209 = vector.shape_cast %208 : vector<2xf32> to vector<2x1xf32>
    %210 = tpu.reciprocal %209 {approx = true} : vector<2x1xf32> -> vector<2x1xf32>
    %cst_69 = arith.constant 5.000000e-01 : f32
    %211 = vector.broadcast %cst_69 : f32 to vector<2x1xf32>
    %212 = arith.mulf %210, %211 : vector<2x1xf32>
    %213 = vector.broadcast %212 : vector<2x1xf32> to vector<2x16xf32>
    %214 = arith.mulf %207, %213 : vector<2x16xf32>
    %cst_70 = arith.constant dense<0.000000e+00> : vector<16xf32>
    %215 = vector.multi_reduction <add>, %214, %cst_70 [0] : vector<2x16xf32> to vector<16xf32>
    %216 = vector.shape_cast %215 : vector<16xf32> to vector<1x16xf32>
    %217 = tpu.reciprocal %216 {approx = true} : vector<1x16xf32> -> vector<1x16xf32>
    %cst_71 = arith.constant 6.250000e-02 : f32
    %218 = vector.broadcast %cst_71 : f32 to vector<1x16xf32>
    %219 = arith.mulf %217, %218 : vector<1x16xf32>
    %220 = vector.broadcast %219 : vector<1x16xf32> to vector<2x16xf32>
    %221 = arith.mulf %214, %220 : vector<2x16xf32>
    %cst_72 = arith.constant dense<0.000000e+00> : vector<2xf32>
    %222 = vector.multi_reduction <add>, %221, %cst_72 [1] : vector<2x16xf32> to vector<2xf32>
    %223 = vector.shape_cast %222 : vector<2xf32> to vector<2x1xf32>
    %224 = tpu.reciprocal %223 {approx = true} : vector<2x1xf32> -> vector<2x1xf32>
    %cst_73 = arith.constant 5.000000e-01 : f32
    %225 = vector.broadcast %cst_73 : f32 to vector<2x1xf32>
    %226 = arith.mulf %224, %225 : vector<2x1xf32>
    %227 = vector.broadcast %226 : vector<2x1xf32> to vector<2x16xf32>
    %228 = arith.mulf %221, %227 : vector<2x16xf32>
    %cst_74 = arith.constant dense<0.000000e+00> : vector<16xf32>
    %229 = vector.multi_reduction <add>, %228, %cst_74 [0] : vector<2x16xf32> to vector<16xf32>
    %230 = vector.shape_cast %229 : vector<16xf32> to vector<1x16xf32>
    %231 = tpu.reciprocal %230 {approx = true} : vector<1x16xf32> -> vector<1x16xf32>
    %cst_75 = arith.constant 6.250000e-02 : f32
    %232 = vector.broadcast %cst_75 : f32 to vector<1x16xf32>
    %233 = arith.mulf %231, %232 : vector<1x16xf32>
    %234 = vector.broadcast %233 : vector<1x16xf32> to vector<2x16xf32>
    %235 = arith.mulf %228, %234 : vector<2x16xf32>
    %cst_76 = arith.constant dense<0.000000e+00> : vector<2xf32>
    %236 = vector.multi_reduction <add>, %235, %cst_76 [1] : vector<2x16xf32> to vector<2xf32>
    %237 = vector.shape_cast %236 : vector<2xf32> to vector<2x1xf32>
    %238 = tpu.reciprocal %237 {approx = true} : vector<2x1xf32> -> vector<2x1xf32>
    %cst_77 = arith.constant 5.000000e-01 : f32
    %239 = vector.broadcast %cst_77 : f32 to vector<2x1xf32>
    %240 = arith.mulf %238, %239 : vector<2x1xf32>
    %241 = vector.broadcast %240 : vector<2x1xf32> to vector<2x16xf32>
    %242 = arith.mulf %235, %241 : vector<2x16xf32>
    %cst_78 = arith.constant dense<0.000000e+00> : vector<16xf32>
    %243 = vector.multi_reduction <add>, %242, %cst_78 [0] : vector<2x16xf32> to vector<16xf32>
    %244 = vector.shape_cast %243 : vector<16xf32> to vector<1x16xf32>
    %245 = tpu.reciprocal %244 {approx = true} : vector<1x16xf32> -> vector<1x16xf32>
    %cst_79 = arith.constant 6.250000e-02 : f32
    %246 = vector.broadcast %cst_79 : f32 to vector<1x16xf32>
    %247 = arith.mulf %245, %246 : vector<1x16xf32>
    %248 = vector.broadcast %247 : vector<1x16xf32> to vector<2x16xf32>
    %249 = arith.mulf %242, %248 : vector<2x16xf32>
    %cst_80 = arith.constant dense<0.000000e+00> : vector<2xf32>
    %250 = vector.multi_reduction <add>, %249, %cst_80 [1] : vector<2x16xf32> to vector<2xf32>
    %251 = vector.shape_cast %250 : vector<2xf32> to vector<2x1xf32>
    %252 = tpu.reciprocal %251 {approx = true} : vector<2x1xf32> -> vector<2x1xf32>
    %cst_81 = arith.constant 5.000000e-01 : f32
    %253 = vector.broadcast %cst_81 : f32 to vector<2x1xf32>
    %254 = arith.mulf %252, %253 : vector<2x1xf32>
    %255 = vector.broadcast %254 : vector<2x1xf32> to vector<2x16xf32>
    %256 = arith.mulf %249, %255 : vector<2x16xf32>
    %cst_82 = arith.constant dense<0.000000e+00> : vector<16xf32>
    %257 = vector.multi_reduction <add>, %256, %cst_82 [0] : vector<2x16xf32> to vector<16xf32>
    %258 = vector.shape_cast %257 : vector<16xf32> to vector<1x16xf32>
    %259 = tpu.reciprocal %258 {approx = true} : vector<1x16xf32> -> vector<1x16xf32>
    %cst_83 = arith.constant 6.250000e-02 : f32
    %260 = vector.broadcast %cst_83 : f32 to vector<1x16xf32>
    %261 = arith.mulf %259, %260 : vector<1x16xf32>
    %262 = vector.broadcast %261 : vector<1x16xf32> to vector<2x16xf32>
    %263 = arith.mulf %256, %262 : vector<2x16xf32>
    %cst_84 = arith.constant dense<0.000000e+00> : vector<2xf32>
    %264 = vector.multi_reduction <add>, %263, %cst_84 [1] : vector<2x16xf32> to vector<2xf32>
    %265 = vector.shape_cast %264 : vector<2xf32> to vector<2x1xf32>
    %266 = tpu.reciprocal %265 {approx = true} : vector<2x1xf32> -> vector<2x1xf32>
    %cst_85 = arith.constant 5.000000e-01 : f32
    %267 = vector.broadcast %cst_85 : f32 to vector<2x1xf32>
    %268 = arith.mulf %266, %267 : vector<2x1xf32>
    %269 = vector.broadcast %268 : vector<2x1xf32> to vector<2x16xf32>
    %270 = arith.mulf %263, %269 : vector<2x16xf32>
    %cst_86 = arith.constant dense<0.000000e+00> : vector<16xf32>
    %271 = vector.multi_reduction <add>, %270, %cst_86 [0] : vector<2x16xf32> to vector<16xf32>
    %272 = vector.shape_cast %271 : vector<16xf32> to vector<1x16xf32>
    %273 = tpu.reciprocal %272 {approx = true} : vector<1x16xf32> -> vector<1x16xf32>
    %cst_87 = arith.constant 6.250000e-02 : f32
    %274 = vector.broadcast %cst_87 : f32 to vector<1x16xf32>
    %275 = arith.mulf %273, %274 : vector<1x16xf32>
    %276 = vector.broadcast %275 : vector<1x16xf32> to vector<2x16xf32>
    %277 = arith.mulf %270, %276 : vector<2x16xf32>
    %cst_88 = arith.constant dense<0.000000e+00> : vector<2xf32>
    %278 = vector.multi_reduction <add>, %277, %cst_88 [1] : vector<2x16xf32> to vector<2xf32>
    %279 = vector.shape_cast %278 : vector<2xf32> to vector<2x1xf32>
    %280 = tpu.reciprocal %279 {approx = true} : vector<2x1xf32> -> vector<2x1xf32>
    %cst_89 = arith.constant 5.000000e-01 : f32
    %281 = vector.broadcast %cst_89 : f32 to vector<2x1xf32>
    %282 = arith.mulf %280, %281 : vector<2x1xf32>
    %283 = vector.broadcast %282 : vector<2x1xf32> to vector<2x16xf32>
    %284 = arith.mulf %277, %283 : vector<2x16xf32>
    %cst_90 = arith.constant dense<0.000000e+00> : vector<16xf32>
    %285 = vector.multi_reduction <add>, %284, %cst_90 [0] : vector<2x16xf32> to vector<16xf32>
    %286 = vector.shape_cast %285 : vector<16xf32> to vector<1x16xf32>
    %287 = tpu.reciprocal %286 {approx = true} : vector<1x16xf32> -> vector<1x16xf32>
    %cst_91 = arith.constant 6.250000e-02 : f32
    %288 = vector.broadcast %cst_91 : f32 to vector<1x16xf32>
    %289 = arith.mulf %287, %288 : vector<1x16xf32>
    %290 = vector.broadcast %289 : vector<1x16xf32> to vector<2x16xf32>
    %291 = arith.mulf %284, %290 : vector<2x16xf32>
    %cst_92 = arith.constant dense<0.000000e+00> : vector<2xf32>
    %292 = vector.multi_reduction <add>, %291, %cst_92 [1] : vector<2x16xf32> to vector<2xf32>
    %293 = vector.shape_cast %292 : vector<2xf32> to vector<2x1xf32>
    %294 = tpu.reciprocal %293 {approx = true} : vector<2x1xf32> -> vector<2x1xf32>
    %cst_93 = arith.constant 5.000000e-01 : f32
    %295 = vector.broadcast %cst_93 : f32 to vector<2x1xf32>
    %296 = arith.mulf %294, %295 : vector<2x1xf32>
    %297 = vector.broadcast %296 : vector<2x1xf32> to vector<2x16xf32>
    %298 = arith.mulf %291, %297 : vector<2x16xf32>
    %cst_94 = arith.constant dense<0.000000e+00> : vector<16xf32>
    %299 = vector.multi_reduction <add>, %298, %cst_94 [0] : vector<2x16xf32> to vector<16xf32>
    %300 = vector.shape_cast %299 : vector<16xf32> to vector<1x16xf32>
    %301 = tpu.reciprocal %300 {approx = true} : vector<1x16xf32> -> vector<1x16xf32>
    %cst_95 = arith.constant 6.250000e-02 : f32
    %302 = vector.broadcast %cst_95 : f32 to vector<1x16xf32>
    %303 = arith.mulf %301, %302 : vector<1x16xf32>
    %304 = vector.broadcast %303 : vector<1x16xf32> to vector<2x16xf32>
    %305 = arith.mulf %298, %304 : vector<2x16xf32>
    %cst_96 = arith.constant dense<0.000000e+00> : vector<2xf32>
    %306 = vector.multi_reduction <add>, %305, %cst_96 [1] : vector<2x16xf32> to vector<2xf32>
    %307 = vector.shape_cast %306 : vector<2xf32> to vector<2x1xf32>
    %308 = tpu.reciprocal %307 {approx = true} : vector<2x1xf32> -> vector<2x1xf32>
    %cst_97 = arith.constant 5.000000e-01 : f32
    %309 = vector.broadcast %cst_97 : f32 to vector<2x1xf32>
    %310 = arith.mulf %308, %309 : vector<2x1xf32>
    %311 = vector.broadcast %310 : vector<2x1xf32> to vector<2x16xf32>
    %312 = arith.mulf %305, %311 : vector<2x16xf32>
    %cst_98 = arith.constant dense<0.000000e+00> : vector<16xf32>
    %313 = vector.multi_reduction <add>, %312, %cst_98 [0] : vector<2x16xf32> to vector<16xf32>
    %314 = vector.shape_cast %313 : vector<16xf32> to vector<1x16xf32>
    %315 = tpu.reciprocal %314 {approx = true} : vector<1x16xf32> -> vector<1x16xf32>
    %316 = arith.mulf %314, %315 : vector<1x16xf32>
    %cst_99 = arith.constant 2.000000e+00 : f32
    %317 = vector.broadcast %cst_99 : f32 to vector<1x16xf32>
    %318 = arith.subf %317, %316 : vector<1x16xf32>
    %319 = arith.mulf %315, %318 : vector<1x16xf32>
    %cst_100 = arith.constant 6.250000e-02 : f32
    %320 = vector.broadcast %cst_100 : f32 to vector<1x16xf32>
    %321 = arith.mulf %319, %320 : vector<1x16xf32>
    %322 = vector.broadcast %321 : vector<1x16xf32> to vector<2x16xf32>
    %323 = arith.mulf %312, %322 : vector<2x16xf32>
    %cst_101 = arith.constant dense<0.000000e+00> : vector<2xf32>
    %324 = vector.multi_reduction <add>, %323, %cst_101 [1] : vector<2x16xf32> to vector<2xf32>
    %325 = vector.shape_cast %324 : vector<2xf32> to vector<2x1xf32>
    %326 = tpu.reciprocal %325 {approx = true} : vector<2x1xf32> -> vector<2x1xf32>
    %327 = arith.mulf %325, %326 : vector<2x1xf32>
    %cst_102 = arith.constant 2.000000e+00 : f32
    %328 = vector.broadcast %cst_102 : f32 to vector<2x1xf32>
    %329 = arith.subf %328, %327 : vector<2x1xf32>
    %330 = arith.mulf %326, %329 : vector<2x1xf32>
    %cst_103 = arith.constant 5.000000e-01 : f32
    %331 = vector.broadcast %cst_103 : f32 to vector<2x1xf32>
    %332 = arith.mulf %330, %331 : vector<2x1xf32>
    %333 = vector.broadcast %332 : vector<2x1xf32> to vector<2x16xf32>
    %334 = arith.mulf %323, %333 : vector<2x16xf32>
    %cst_104 = arith.constant 14.2857141 : f32
    %335 = vector.broadcast %cst_104 : f32 to vector<2x16xf32>
    %336 = arith.mulf %5, %335 : vector<2x16xf32>
    %cst_105 = arith.constant dense<0xFF800000> : vector<2xf32>
    %337 = vector.multi_reduction <maximumf>, %336, %cst_105 [1] : vector<2x16xf32> to vector<2xf32>
    %338 = vector.shape_cast %337 : vector<2xf32> to vector<2x1xf32>
    %339 = vector.broadcast %338 : vector<2x1xf32> to vector<2x16xf32>
    %340 = arith.subf %336, %339 : vector<2x16xf32>
    %341 = math.exp %340 : vector<2x16xf32>
    %cst_106 = arith.constant dense<0.000000e+00> : vector<2xf32>
    %342 = vector.multi_reduction <add>, %341, %cst_106 [1] : vector<2x16xf32> to vector<2xf32>
    %343 = vector.shape_cast %342 : vector<2xf32> to vector<2x1xf32>
    %344 = math.log %343 : vector<2x1xf32>
    %345 = vector.broadcast %344 : vector<2x1xf32> to vector<2x16xf32>
    %346 = arith.subf %340, %345 : vector<2x16xf32>
    %cst_107 = arith.constant 14.2857141 : f32
    %347 = vector.broadcast %cst_107 : f32 to vector<2x16xf32>
    %348 = arith.mulf %6, %347 : vector<2x16xf32>
    %cst_108 = arith.constant dense<0xFF800000> : vector<2xf32>
    %349 = vector.multi_reduction <maximumf>, %348, %cst_108 [1] : vector<2x16xf32> to vector<2xf32>
    %350 = vector.shape_cast %349 : vector<2xf32> to vector<2x1xf32>
    %351 = vector.broadcast %350 : vector<2x1xf32> to vector<2x16xf32>
    %352 = arith.subf %348, %351 : vector<2x16xf32>
    %353 = math.exp %352 : vector<2x16xf32>
    %cst_109 = arith.constant dense<0.000000e+00> : vector<2xf32>
    %354 = vector.multi_reduction <add>, %353, %cst_109 [1] : vector<2x16xf32> to vector<2xf32>
    %355 = vector.shape_cast %354 : vector<2xf32> to vector<2x1xf32>
    %356 = math.log %355 : vector<2x1xf32>
    %357 = vector.broadcast %356 : vector<2x1xf32> to vector<2x16xf32>
    %358 = arith.subf %352, %357 : vector<2x16xf32>
    %359 = arith.mulf %170, %358 : vector<2x16xf32>
    %360 = arith.mulf %334, %346 : vector<2x16xf32>
    %361 = arith.addf %359, %360 : vector<2x16xf32>
    %cst_110 = arith.constant dense<0.000000e+00> : vector<2xf32>
    %362 = vector.multi_reduction <add>, %361, %cst_110 [1] : vector<2x16xf32> to vector<2xf32>
    %363 = vector.shape_cast %362 : vector<2xf32> to vector<2x1xf32>
    %cst_111 = arith.constant dense<0.000000e+00> : vector<1xf32>
    %364 = vector.multi_reduction <add>, %363, %cst_111 [0] : vector<2x1xf32> to vector<1xf32>
    %365 = vector.shape_cast %364 : vector<1xf32> to vector<1x1xf32>
    %cst_112 = arith.constant -5.000000e-01 : f32
    %366 = vector.broadcast %cst_112 : f32 to vector<1x1xf32>
    %367 = arith.mulf %366, %365 : vector<1x1xf32>
    %c0_113 = arith.constant 0 : index
    %c0_114 = arith.constant 0 : index
    %368 = vector.load %arg3[%c0_113, %c0_114] : memref<1x1xf32, #tpu.memory_space<vmem>>, vector<1x1xf32>
    tpu.vector_store %arg3[%c0_113, %c0_114], %367 {strides = array<i32>} : memref<1x1xf32, #tpu.memory_space<vmem>>, vector<1x1xf32>,
    return
  }
}

</mosaic_0001>

<bundles_post_ra>
// kernel: tpu_custom_call.1
= control target key start
LH: loop header
LB: loop body
LE: loop exit
PB: predicated region body
PF: predicated region fallthrough
CT: control target
= control target key end

     0   :  { %8 = vsyncpa [#allocation3], 0  ;;  %s1035_s0 = inlined_call_operand.hbm [shape: f32[2,4,256], index: 0, kind: input, shape index: {}]   ;;  %s1036_s1 = inlined_call_operand.hbm [shape: f32[2,4,256], index: 1, kind: input, shape index: {}]   ;;  %s1037_s2 = inlined_call_operand.vmem [shape: f32[4,16], index: 2, kind: input, shape index: {}]   ;;  %s1038_s3 = inlined_call_operand.hbm [shape: f32[1,1], index: 3, kind: output, shape index: {}]  }
   0x1   :  { %9 = vsyncpa [#allocation6], 0 }
   0x2   :  { %10 = vsyncpa [#allocation4], 0  ;;  %s895_s12 = smov [#allocation2]   ;;  %s823_s16 = scalar_lea.hbm %s1035_s0, 256 }
   0x3   :  { %s16_s13 = sshll.u32 %s895_s12, 4  ;;  %p824_p0 = scmp.ne.s32.totalorder %s1035_s0, %s823_s16  ;;  %s17_s13 = int_to_ptr.vmem [resolvable:$true] %s16_s13 }
   0x4   :  { %p827_p1 = scmp.lt.u32.totalorder %s823_s16, %s1035_s0 }
   0x6   :  { %p829_p2 = pnand %p827_p1, %p824_p0 }
   0x8   :  { %832 = shalt.err (!%p829_p2)
}
   0x9   :  { %s833_s21 = scalar_lea.vmem %s17_s13, 256  ;;  %p838_p4 = scmp.lt.s32.totalorder %s17_s13, %s17_s13 }
   0xa   :  { %p834_p3 = scmp.ne.s32.totalorder %s17_s13, %s833_s21  ;;  %p839_p5 = scmp.lt.s32.totalorder %s833_s21, %s833_s21 }
   0xc   :  { %p840_p6 = por %p839_p5, %p838_p4 }
   0xe   :  { %p841_p7 = pnand %p840_p6, %p834_p3 }
  0x10   :  { %844 = shalt.err (!%p841_p7)
}
  0x11   :  { %s896_s22 = smov 128   ;;  %s897_s23 = smov 8  }
  0x12   :  { %22 = dma.hbm_to_vmem [thread:$0]  %s1035_s0, 256, %s17_s13, [#allocation3], %s896_s22, %s896_s22, %s897_s23  }
  0x13   :  { %s898_s26 = smov [#allocation5]   ;;  %s845_s30 = scalar_lea.hbm %s1036_s1, 256 }
  0x14   :  { %s28_s27 = sshll.u32 %s898_s26, 4  ;;  %p846_p8 = scmp.ne.s32.totalorder %s1036_s1, %s845_s30  ;;  %s29_s27 = int_to_ptr.vmem [resolvable:$true] %s28_s27 }
  0x15   :  { %p849_p9 = scmp.lt.u32.totalorder %s845_s30, %s1036_s1 }
  0x17   :  { %p851_p10 = pnand %p849_p9, %p846_p8 }
  0x19   :  { %854 = shalt.err (!%p851_p10)
}
  0x1a   :  { %s855_s8 = scalar_lea.vmem %s29_s27, 256  ;;  %p860_p12 = scmp.lt.s32.totalorder %s29_s27, %s29_s27 }
  0x1b   :  { %p856_p11 = scmp.ne.s32.totalorder %s29_s27, %s855_s8  ;;  %p861_p13 = scmp.lt.s32.totalorder %s855_s8, %s855_s8 }
  0x1d   :  { %p862_p0 = por %p861_p13, %p860_p12 }
  0x1f   :  { %p863_p1 = pnand %p862_p0, %p856_p11 }
  0x21   :  { %866 = shalt.err (!%p863_p1)
}
  0x22   :  { %34 = dma.hbm_to_vmem [thread:$0]  %s1036_s1, 256, %s29_s27, [#allocation6], %s896_s22, %s896_s22, %s897_s23  }
  0x23   :  { %889 = dma.done.wait [#allocation3], 256  }
  0x24   :  { %890 = vsyncadd [#allocation3], 4294967040 }
  0x25   :  { %891 = dma.done.wait [#allocation6], 256  }
  0x26   :  { %892 = vsyncadd [#allocation6], 4294967040  ;;  %vm52_vm0 = vcmask 1043456   ;;  %v63_v0 = vld [vmem:[#allocation5] sm:$0xff]  ;;  %v44_v1 = vld [vmem:[#allocation2] sm:$0xff]  ;;  %v899_v21 = vmov 0.0   ;;  %v83_v22 = vlaneseq }
  0x27   :  { %v64_v2 = vld [vmem:[#allocation5 + $0x8] sm:$0xff]  ;;  %v67_v3 = vcombine.high %v63_v0, %v63_v0  ;;  %v71_v4 = vsel %vm52_vm0, %v63_v0, 0.0  ;;  %v48_v5 = vcombine.high %v44_v1, %v44_v1  ;;  %v53_v6 = vsel %vm52_vm0, %v44_v1, 0.0  ;;  %v45_v7 = vld [vmem:[#allocation2 + $0x8] sm:$0xff]  ;;  %v43_v20 = vld [vmem:[%s1037_s2] sm:$0xf]  ;;  %706 = vmatprep.subr.mxu0 %v899_v21  ;;  %711 = vmatprep.subr.mxu1 %v899_v21 }
  0x28   :  { %v68_v8 = vcombine.high %v64_v2, %v64_v2  ;;  %v49_v9 = vcombine.high %v45_v7, %v45_v7  ;;  %v76_v12 = vsel %vm52_vm0, %v64_v2, 0.0  ;;  %v58_v13 = vsel %vm52_vm0, %v45_v7, 0.0  ;;  %707 = vmatpush3.msk.msra.mxu0 %vm52_vm0, %v43_v20  ;;  %712 = vmatpush3.msk.msra.mxu1 %vm52_vm0, %v43_v20  ;;  %s901_s2 = smov [#allocation7]  }
  0x29   :  { %v72_v10 = vsel %vm52_vm0, %v67_v3, 0.0  ;;  %v54_v11 = vsel %vm52_vm0, %v48_v5, 0.0  ;;  %vm900_vm1 = vmmov 0   ;;  %v84_v23 = vand.u32 127, %v83_v22  ;;  %s688_s11 = sshll.u32 %s901_s2, 4  ;;  %s689_s11 = int_to_ptr.vmem [resolvable:$true] %s688_s11 }
  0x2a   :  { %v73_v14 = vadd.f32 %v72_v10, %v71_v4  ;;  %v55_v15 = vadd.f32 %v54_v11, %v53_v6  ;;  %v77_v16 = vsel %vm52_vm0, %v68_v8, 0.0  ;;  %v59_v17 = vsel %vm52_vm0, %v49_v9, 0.0  ;;  %708 = vmatprep.mubr.msk.f32.mxu0 %vm900_vm1, %v899_v21  ;;  %713 = vmatprep.mubr.msk.f32.mxu1 %vm900_vm1, %v899_v21  ;;  %s867_s12 = scalar_lea.vmem %s689_s11, 16  ;;  %s871_s13 = scalar_lea.vmem %s689_s11, 32 }
  0x2b   :  { %v78_v18 = vadd.f32 %v77_v16, %v76_v12  ;;  %v60_v19 = vadd.f32 %v59_v17, %v58_v13  ;;  %v86_v24 = vshrl.u32 %v83_v22, 7  ;;  %vm93_vm2 = vcmask 1041409   ;;  %p868_p2 = scmp.ne.s32.totalorder %s689_s11, %s867_s12  ;;  %p872_p3 = scmp.lt.s32.totalorder %s689_s11, %s689_s11 }
  0x2c   :  { %74 = vadd.xlane.f32.xlu1 %v73_v14  ;;  %56 = vadd.xlane.f32.xlu0 %v55_v15  ;;  %vm95_vm3 = vcmask 31744   ;;  %vm254_vm4 = vcmask 123904   ;;  %vm258_vm5 = vcmask 1041408   ;;  %vm680_vm6 = vcmask 0   ;;  %p873_p4 = scmp.lt.s32.totalorder %s871_s13, %s867_s12 }
  0x2d   :  { %v87_v27 = vsub.s32 %v84_v23, %v86_v24 }
  0x2e   :  { %p874_p5 = por %p873_p4, %p872_p3 }
  0x30   :  { %79 = vadd.xlane.f32.xlu1 %v78_v18  ;;  %61 = vadd.xlane.f32.xlu0 %v60_v19  ;;  %p875_p6 = pnand %p874_p5, %p868_p2 }
  0xb9   :  { %v75_v25 = vpop.xlane.xlu1 %74  ;;  %v57_v26 = vpop.xlane.xlu0 %56 }
  0xba   :  { %v176_v30 = vrot.slane %v75_v25, %v87_v27  ;;  %v88_v31 = vrot.slane %v57_v26, %v87_v27 }
  0xbd   :  { %v80_v28 = vpop.xlane.xlu1 %79  ;;  %v62_v29 = vpop.xlane.xlu0 %61 }
  0xbe   :  { %v180_v32 = vrot.slane %v80_v28, %v87_v27  ;;  %v92_v33 = vrot.slane %v62_v29, %v87_v27 }
  0xc0   :  { %v94_v34 = vsel %vm93_vm2, %v92_v33, %v88_v31  ;;  %v181_v35 = vsel %vm93_vm2, %v180_v32, %v176_v30 }
  0xc1   :  { %709 = vmatmul.mubr.msk.f32.vlgmr.msra.gmra.mrb[0].mxu0 %vm95_vm3, %v94_v34  ;;  %714 = vmatmul.mubr.msk.f32.vlgmr.msra.gmra.mrb[0].mxu1 %vm95_vm3, %v181_v35 }
 0x194   :  { %v959_v36 = vpop.f32.mrb[0].mxu0  ;;  %v961_v37 = vpop.f32.mrb[0].mxu1 }
 0x195   :  { %v710_v38 = vpop.f32.mrb[1].mxu0  ;;  %v715_v39 = vpop.f32.mrb[1].mxu1  ;;  %v448_v40 = vsel %vm254_vm4, %v961_v37, -inf  ;;  %v255_v41 = vsel %vm254_vm4, %v959_v36, -inf }
 0x196   :  { %449 = vmax.xlane.f32.xlu1 %v448_v40  ;;  %256 = vmax.xlane.f32.xlu0 %v255_v41 }
 0x223   :  { %v450_v42 = vpop.xlane.xlu1 %449  ;;  %v257_v43 = vpop.xlane.xlu0 %256 }
 0x224   :  { %v451_v44 = vsel %vm258_vm5, %v450_v42, -inf  ;;  %v259_v45 = vsel %vm258_vm5, %v257_v43, -inf }
 0x225   :  { %v452_v46 = vrot.slane %v451_v44, 4  ;;  %v260_v47 = vrot.slane %v259_v45, 4 }
 0x227   :  { %v453_v48 = vmax.f32 %v451_v44, %v452_v46  ;;  %v261_v49 = vmax.f32 %v259_v45, %v260_v47 }
 0x229   :  { %v454_v50 = vrot.slane %v453_v48, 2  ;;  %v262_v51 = vrot.slane %v261_v49, 2 }
 0x22b   :  { %v455_v52 = vmax.f32 %v453_v48, %v454_v50  ;;  %v263_v53 = vmax.f32 %v261_v49, %v262_v51 }
 0x22d   :  { %v456_v54 = vrot.slane %v455_v52, 1  ;;  %v264_v55 = vrot.slane %v263_v53, 1 }
 0x22f   :  { %v457_v56 = vmax.f32 %v455_v52, %v456_v54  ;;  %v265_v57 = vmax.f32 %v263_v53, %v264_v55 }
 0x231   :  { %v458_v58 = vsub.f32 %v961_v37, %v457_v56  ;;  %v266_v59 = vsub.f32 %v959_v36, %v265_v57 }
 0x233   :  { %v459_v60 = vmul.f32 20.0, %v458_v58  ;;  %v267_v61 = vmul.f32 20.0, %v266_v59 }
 0x235   :  { %v460_v62 = vmul.f32 1.442695, %v459_v60  ;;  %v268_v63 = vmul.f32 1.442695, %v267_v61 }
 0x237   :  { %727 = vpow2.f32 %v460_v62 }
 0x238   :  { %729 = vpow2.f32 %v268_v63 }
 0x241   :  { %v728_v0 = vpop.eup %727 }
 0x242   :  { %v730_v1 = vpop.eup %729  ;;  %v462_v2 = vsel %vm254_vm4, %v728_v0, 0.0 }
 0x243   :  { %463 = vadd.xlane.f32.xlu1 %v462_v2  ;;  %v270_v3 = vsel %vm254_vm4, %v730_v1, 0.0 }
 0x244   :  { %271 = vadd.xlane.f32.xlu0 %v270_v3 }
 0x2d0   :  { %v464_v4 = vpop.xlane.xlu1 %463 }
 0x2d1   :  { %v465_v5 = vsel %vm258_vm5, %v464_v4, 0.0  ;;  %v272_v6 = vpop.xlane.xlu0 %271 }
 0x2d2   :  { %v466_v7 = vrot.slane %v465_v5, 4  ;;  %v273_v8 = vsel %vm258_vm5, %v272_v6, 0.0 }
 0x2d3   :  { %v274_v9 = vrot.slane %v273_v8, 4 }
 0x2d4   :  { %v467_v10 = vadd.f32 %v466_v7, %v465_v5 }
 0x2d5   :  { %v275_v11 = vadd.f32 %v274_v9, %v273_v8 }
 0x2d6   :  { %v468_v12 = vrot.slane %v467_v10, 2 }
 0x2d7   :  { %v276_v13 = vrot.slane %v275_v11, 2 }
 0x2d8   :  { %v469_v14 = vadd.f32 %v468_v12, %v467_v10 }
 0x2d9   :  { %v277_v15 = vadd.f32 %v276_v13, %v275_v11 }
 0x2da   :  { %v470_v16 = vrot.slane %v469_v14, 1 }
 0x2db   :  { %v278_v17 = vrot.slane %v277_v15, 1 }
 0x2dc   :  { %v471_v18 = vadd.f32 %v470_v16, %v469_v14 }
 0x2dd   :  { %v279_v19 = vadd.f32 %v278_v17, %v277_v15 }
 0x2de   :  { %731 = vrcp.f32 %v471_v18 }
 0x2df   :  { %733 = vrcp.f32 %v279_v19 }
 0x2e8   :  { %v732_v20 = vpop.eup %731 }
 0x2e9   :  { %v734_v21 = vpop.eup %733  ;;  %v473_v22 = vmul.f32 %v732_v20, %v728_v0 }
 0x2ea   :  { %v281_v23 = vmul.f32 %v734_v21, %v730_v1 }
 0x2eb   :  { %v474_v24 = vsel %vm254_vm4, %v473_v22, 0.0 }
 0x2ec   :  { %v475_v25 = vrot.slane %v474_v24, 4  ;;  %v282_v26 = vsel %vm254_vm4, %v281_v23, 0.0 }
 0x2ed   :  { %v283_v27 = vrot.slane %v282_v26, 4 }
 0x2ee   :  { %v476_v28 = vadd.f32 %v475_v25, %v474_v24 }
 0x2ef   :  { %v284_v29 = vadd.f32 %v283_v27, %v282_v26 }
 0x2f0   :  { %v477_v30 = vrot.slane %v476_v28, 2 }
 0x2f1   :  { %v285_v31 = vrot.slane %v284_v29, 2 }
 0x2f2   :  { %v478_v32 = vadd.f32 %v477_v30, %v476_v28 }
 0x2f3   :  { %v286_v33 = vadd.f32 %v285_v31, %v284_v29 }
 0x2f4   :  { %v479_v34 = vrot.slane %v478_v32, 1 }
 0x2f5   :  { %v287_v35 = vrot.slane %v286_v33, 1 }
 0x2f6   :  { %v480_v38 = vadd.f32 %v479_v34, %v478_v32 }
 0x2f7   :  { %v288_v39 = vadd.f32 %v287_v35, %v286_v33 }
 0x2f8   :  { %735 = vrcp.f32 %v480_v38 }
 0x2f9   :  { %737 = vrcp.f32 %v288_v39 }
 0x302   :  { %v736_v40 = vpop.eup %735 }
 0x303   :  { %v738_v41 = vpop.eup %737  ;;  %v482_v42 = vmul.f32 0.0625, %v736_v40 }
 0x304   :  { %v290_v43 = vmul.f32 0.0625, %v738_v41 }
 0x305   :  { %v483_v44 = vmul.f32 %v482_v42, %v473_v22 }
 0x306   :  { %v291_v45 = vmul.f32 %v290_v43, %v281_v23 }
 0x307   :  { %v484_v46 = vsel %vm254_vm4, %v483_v44, 0.0 }
 0x308   :  { %485 = vadd.xlane.f32.xlu1 %v484_v46  ;;  %v292_v47 = vsel %vm254_vm4, %v291_v45, 0.0 }
 0x309   :  { %293 = vadd.xlane.f32.xlu0 %v292_v47 }
 0x395   :  { %v486_v48 = vpop.xlane.xlu1 %485 }
 0x396   :  { %739 = vrcp.f32 %v486_v48  ;;  %v294_v49 = vpop.xlane.xlu0 %293 }
 0x397   :  { %741 = vrcp.f32 %v294_v49 }
 0x3a0   :  { %v740_v50 = vpop.eup %739 }
 0x3a1   :  { %v742_v51 = vpop.eup %741  ;;  %v488_v52 = vmul.f32 0.5, %v740_v50 }
 0x3a2   :  { %v296_v53 = vmul.f32 0.5, %v742_v51 }
 0x3a3   :  { %v489_v54 = vmul.f32 %v488_v52, %v483_v44 }
 0x3a4   :  { %v297_v55 = vmul.f32 %v296_v53, %v291_v45 }
 0x3a5   :  { %v490_v56 = vsel %vm254_vm4, %v489_v54, 0.0 }
 0x3a6   :  { %v491_v57 = vrot.slane %v490_v56, 4  ;;  %v298_v58 = vsel %vm254_vm4, %v297_v55, 0.0 }
 0x3a7   :  { %v299_v59 = vrot.slane %v298_v58, 4 }
 0x3a8   :  { %v492_v60 = vadd.f32 %v491_v57, %v490_v56 }
 0x3a9   :  { %v300_v61 = vadd.f32 %v299_v59, %v298_v58 }
 0x3aa   :  { %v493_v62 = vrot.slane %v492_v60, 2 }
 0x3ab   :  { %v301_v63 = vrot.slane %v300_v61, 2 }
 0x3ac   :  { %v494_v0 = vadd.f32 %v493_v62, %v492_v60 }
 0x3ad   :  { %v302_v1 = vadd.f32 %v301_v63, %v300_v61 }
 0x3ae   :  { %v495_v2 = vrot.slane %v494_v0, 1 }
 0x3af   :  { %v303_v3 = vrot.slane %v302_v1, 1 }
 0x3b0   :  { %v496_v4 = vadd.f32 %v495_v2, %v494_v0 }
 0x3b1   :  { %v304_v5 = vadd.f32 %v303_v3, %v302_v1 }
 0x3b2   :  { %743 = vrcp.f32 %v496_v4 }
 0x3b3   :  { %745 = vrcp.f32 %v304_v5 }
 0x3bc   :  { %v744_v6 = vpop.eup %743 }
 0x3bd   :  { %v746_v7 = vpop.eup %745  ;;  %v498_v8 = vmul.f32 0.0625, %v744_v6 }
 0x3be   :  { %v306_v9 = vmul.f32 0.0625, %v746_v7 }
 0x3bf   :  { %v499_v10 = vmul.f32 %v498_v8, %v489_v54 }
 0x3c0   :  { %v307_v11 = vmul.f32 %v306_v9, %v297_v55 }
 0x3c1   :  { %v500_v12 = vsel %vm254_vm4, %v499_v10, 0.0 }
 0x3c2   :  { %501 = vadd.xlane.f32.xlu1 %v500_v12  ;;  %v308_v13 = vsel %vm254_vm4, %v307_v11, 0.0 }
 0x3c3   :  { %309 = vadd.xlane.f32.xlu0 %v308_v13 }
 0x44f   :  { %v502_v14 = vpop.xlane.xlu1 %501 }
 0x450   :  { %747 = vrcp.f32 %v502_v14  ;;  %v310_v15 = vpop.xlane.xlu0 %309 }
 0x451   :  { %749 = vrcp.f32 %v310_v15 }
 0x45a   :  { %v748_v16 = vpop.eup %747 }
 0x45b   :  { %v750_v17 = vpop.eup %749  ;;  %v504_v18 = vmul.f32 0.5, %v748_v16 }
 0x45c   :  { %v312_v19 = vmul.f32 0.5, %v750_v17 }
 0x45d   :  { %v505_v20 = vmul.f32 %v504_v18, %v499_v10 }
 0x45e   :  { %v313_v21 = vmul.f32 %v312_v19, %v307_v11 }
 0x45f   :  { %v506_v22 = vsel %vm254_vm4, %v505_v20, 0.0 }
 0x460   :  { %v507_v23 = vrot.slane %v506_v22, 4  ;;  %v314_v24 = vsel %vm254_vm4, %v313_v21, 0.0 }
 0x461   :  { %v315_v25 = vrot.slane %v314_v24, 4 }
 0x462   :  { %v508_v26 = vadd.f32 %v507_v23, %v506_v22 }
 0x463   :  { %v316_v27 = vadd.f32 %v315_v25, %v314_v24 }
 0x464   :  { %v509_v28 = vrot.slane %v508_v26, 2 }
 0x465   :  { %v317_v29 = vrot.slane %v316_v27, 2 }
 0x466   :  { %v510_v30 = vadd.f32 %v509_v28, %v508_v26 }
 0x467   :  { %v318_v31 = vadd.f32 %v317_v29, %v316_v27 }
 0x468   :  { %v511_v32 = vrot.slane %v510_v30, 1 }
 0x469   :  { %v319_v33 = vrot.slane %v318_v31, 1 }
 0x46a   :  { %v512_v34 = vadd.f32 %v511_v32, %v510_v30 }
 0x46b   :  { %v320_v35 = vadd.f32 %v319_v33, %v318_v31 }
 0x46c   :  { %751 = vrcp.f32 %v512_v34 }
 0x46d   :  { %753 = vrcp.f32 %v320_v35 }
 0x476   :  { %v752_v38 = vpop.eup %751 }
 0x477   :  { %v754_v39 = vpop.eup %753  ;;  %v514_v40 = vmul.f32 0.0625, %v752_v38 }
 0x478   :  { %v322_v41 = vmul.f32 0.0625, %v754_v39 }
 0x479   :  { %v515_v42 = vmul.f32 %v514_v40, %v505_v20 }
 0x47a   :  { %v323_v43 = vmul.f32 %v322_v41, %v313_v21 }
 0x47b   :  { %v516_v44 = vsel %vm254_vm4, %v515_v42, 0.0 }
 0x47c   :  { %517 = vadd.xlane.f32.xlu1 %v516_v44  ;;  %v324_v45 = vsel %vm254_vm4, %v323_v43, 0.0 }
 0x47d   :  { %325 = vadd.xlane.f32.xlu0 %v324_v45 }
 0x509   :  { %v518_v46 = vpop.xlane.xlu1 %517 }
 0x50a   :  { %755 = vrcp.f32 %v518_v46  ;;  %v326_v47 = vpop.xlane.xlu0 %325 }
 0x50b   :  { %757 = vrcp.f32 %v326_v47 }
 0x514   :  { %v756_v48 = vpop.eup %755 }
 0x515   :  { %v758_v49 = vpop.eup %757  ;;  %v520_v50 = vmul.f32 0.5, %v756_v48 }
 0x516   :  { %v328_v51 = vmul.f32 0.5, %v758_v49 }
 0x517   :  { %v521_v52 = vmul.f32 %v520_v50, %v515_v42 }
 0x518   :  { %v329_v53 = vmul.f32 %v328_v51, %v323_v43 }
 0x519   :  { %v522_v54 = vsel %vm254_vm4, %v521_v52, 0.0 }
 0x51a   :  { %v523_v55 = vrot.slane %v522_v54, 4  ;;  %v330_v56 = vsel %vm254_vm4, %v329_v53, 0.0 }
 0x51b   :  { %v331_v57 = vrot.slane %v330_v56, 4 }
 0x51c   :  { %v524_v58 = vadd.f32 %v523_v55, %v522_v54 }
 0x51d   :  { %v332_v59 = vadd.f32 %v331_v57, %v330_v56 }
 0x51e   :  { %v525_v60 = vrot.slane %v524_v58, 2 }
 0x51f   :  { %v333_v61 = vrot.slane %v332_v59, 2 }
 0x520   :  { %v526_v62 = vadd.f32 %v525_v60, %v524_v58 }
 0x521   :  { %v334_v63 = vadd.f32 %v333_v61, %v332_v59 }
 0x522   :  { %v527_v0 = vrot.slane %v526_v62, 1 }
 0x523   :  { %v335_v1 = vrot.slane %v334_v63, 1 }
 0x524   :  { %v528_v2 = vadd.f32 %v527_v0, %v526_v62 }
 0x525   :  { %v336_v3 = vadd.f32 %v335_v1, %v334_v63 }
 0x526   :  { %759 = vrcp.f32 %v528_v2 }
 0x527   :  { %761 = vrcp.f32 %v336_v3 }
 0x530   :  { %v760_v4 = vpop.eup %759 }
 0x531   :  { %v762_v5 = vpop.eup %761  ;;  %v530_v6 = vmul.f32 0.0625, %v760_v4 }
 0x532   :  { %v338_v7 = vmul.f32 0.0625, %v762_v5 }
 0x533   :  { %v531_v8 = vmul.f32 %v530_v6, %v521_v52 }
 0x534   :  { %v339_v9 = vmul.f32 %v338_v7, %v329_v53 }
 0x535   :  { %v532_v10 = vsel %vm254_vm4, %v531_v8, 0.0 }
 0x536   :  { %533 = vadd.xlane.f32.xlu1 %v532_v10  ;;  %v340_v11 = vsel %vm254_vm4, %v339_v9, 0.0 }
 0x537   :  { %341 = vadd.xlane.f32.xlu0 %v340_v11 }
 0x5c3   :  { %v534_v12 = vpop.xlane.xlu1 %533 }
 0x5c4   :  { %763 = vrcp.f32 %v534_v12  ;;  %v342_v13 = vpop.xlane.xlu0 %341 }
 0x5c5   :  { %765 = vrcp.f32 %v342_v13 }
 0x5ce   :  { %v764_v14 = vpop.eup %763 }
 0x5cf   :  { %v766_v15 = vpop.eup %765  ;;  %v536_v16 = vmul.f32 0.5, %v764_v14 }
 0x5d0   :  { %v344_v17 = vmul.f32 0.5, %v766_v15 }
 0x5d1   :  { %v537_v18 = vmul.f32 %v536_v16, %v531_v8 }
 0x5d2   :  { %v345_v19 = vmul.f32 %v344_v17, %v339_v9 }
 0x5d3   :  { %v538_v20 = vsel %vm254_vm4, %v537_v18, 0.0 }
 0x5d4   :  { %v539_v21 = vrot.slane %v538_v20, 4  ;;  %v346_v22 = vsel %vm254_vm4, %v345_v19, 0.0 }
 0x5d5   :  { %v347_v23 = vrot.slane %v346_v22, 4 }
 0x5d6   :  { %v540_v24 = vadd.f32 %v539_v21, %v538_v20 }
 0x5d7   :  { %v348_v25 = vadd.f32 %v347_v23, %v346_v22 }
 0x5d8   :  { %v541_v26 = vrot.slane %v540_v24, 2 }
 0x5d9   :  { %v349_v27 = vrot.slane %v348_v25, 2 }
 0x5da   :  { %v542_v28 = vadd.f32 %v541_v26, %v540_v24 }
 0x5db   :  { %v350_v29 = vadd.f32 %v349_v27, %v348_v25 }
 0x5dc   :  { %v543_v30 = vrot.slane %v542_v28, 1 }
 0x5dd   :  { %v351_v31 = vrot.slane %v350_v29, 1 }
 0x5de   :  { %v544_v32 = vadd.f32 %v543_v30, %v542_v28 }
 0x5df   :  { %v352_v33 = vadd.f32 %v351_v31, %v350_v29 }
 0x5e0   :  { %767 = vrcp.f32 %v544_v32 }
 0x5e1   :  { %769 = vrcp.f32 %v352_v33 }
 0x5ea   :  { %v768_v34 = vpop.eup %767 }
 0x5eb   :  { %v770_v35 = vpop.eup %769  ;;  %v546_v38 = vmul.f32 0.0625, %v768_v34 }
 0x5ec   :  { %v354_v39 = vmul.f32 0.0625, %v770_v35 }
 0x5ed   :  { %v547_v40 = vmul.f32 %v546_v38, %v537_v18 }
 0x5ee   :  { %v355_v41 = vmul.f32 %v354_v39, %v345_v19 }
 0x5ef   :  { %v548_v42 = vsel %vm254_vm4, %v547_v40, 0.0 }
 0x5f0   :  { %549 = vadd.xlane.f32.xlu1 %v548_v42  ;;  %v356_v43 = vsel %vm254_vm4, %v355_v41, 0.0 }
 0x5f1   :  { %357 = vadd.xlane.f32.xlu0 %v356_v43 }
 0x67d   :  { %v550_v44 = vpop.xlane.xlu1 %549 }
 0x67e   :  { %771 = vrcp.f32 %v550_v44  ;;  %v358_v45 = vpop.xlane.xlu0 %357 }
 0x67f   :  { %773 = vrcp.f32 %v358_v45 }
 0x688   :  { %v772_v46 = vpop.eup %771 }
 0x689   :  { %v774_v47 = vpop.eup %773  ;;  %v552_v48 = vmul.f32 0.5, %v772_v46 }
 0x68a   :  { %v360_v49 = vmul.f32 0.5, %v774_v47 }
 0x68b   :  { %v553_v50 = vmul.f32 %v552_v48, %v547_v40 }
 0x68c   :  { %v361_v51 = vmul.f32 %v360_v49, %v355_v41 }
 0x68d   :  { %v554_v52 = vsel %vm254_vm4, %v553_v50, 0.0 }
 0x68e   :  { %v555_v53 = vrot.slane %v554_v52, 4  ;;  %v362_v54 = vsel %vm254_vm4, %v361_v51, 0.0 }
 0x68f   :  { %v363_v55 = vrot.slane %v362_v54, 4 }
 0x690   :  { %v556_v56 = vadd.f32 %v555_v53, %v554_v52 }
 0x691   :  { %v364_v57 = vadd.f32 %v363_v55, %v362_v54 }
 0x692   :  { %v557_v58 = vrot.slane %v556_v56, 2 }
 0x693   :  { %v365_v59 = vrot.slane %v364_v57, 2 }
 0x694   :  { %v558_v60 = vadd.f32 %v557_v58, %v556_v56 }
 0x695   :  { %v366_v61 = vadd.f32 %v365_v59, %v364_v57 }
 0x696   :  { %v559_v62 = vrot.slane %v558_v60, 1 }
 0x697   :  { %v367_v63 = vrot.slane %v366_v61, 1 }
 0x698   :  { %v560_v0 = vadd.f32 %v559_v62, %v558_v60 }
 0x699   :  { %v368_v1 = vadd.f32 %v367_v63, %v366_v61 }
 0x69a   :  { %775 = vrcp.f32 %v560_v0 }
 0x69b   :  { %777 = vrcp.f32 %v368_v1 }
 0x6a4   :  { %v776_v2 = vpop.eup %775 }
 0x6a5   :  { %v778_v3 = vpop.eup %777  ;;  %v562_v4 = vmul.f32 0.0625, %v776_v2 }
 0x6a6   :  { %v370_v5 = vmul.f32 0.0625, %v778_v3 }
 0x6a7   :  { %v563_v6 = vmul.f32 %v562_v4, %v553_v50 }
 0x6a8   :  { %v371_v7 = vmul.f32 %v370_v5, %v361_v51 }
 0x6a9   :  { %v564_v8 = vsel %vm254_vm4, %v563_v6, 0.0 }
 0x6aa   :  { %565 = vadd.xlane.f32.xlu1 %v564_v8  ;;  %v372_v9 = vsel %vm254_vm4, %v371_v7, 0.0 }
 0x6ab   :  { %373 = vadd.xlane.f32.xlu0 %v372_v9 }
 0x737   :  { %v566_v10 = vpop.xlane.xlu1 %565 }
 0x738   :  { %779 = vrcp.f32 %v566_v10  ;;  %v374_v11 = vpop.xlane.xlu0 %373 }
 0x739   :  { %781 = vrcp.f32 %v374_v11 }
 0x742   :  { %v780_v12 = vpop.eup %779 }
 0x743   :  { %v782_v13 = vpop.eup %781  ;;  %v568_v14 = vmul.f32 0.5, %v780_v12 }
 0x744   :  { %v376_v15 = vmul.f32 0.5, %v782_v13 }
 0x745   :  { %v569_v16 = vmul.f32 %v568_v14, %v563_v6 }
 0x746   :  { %v377_v17 = vmul.f32 %v376_v15, %v371_v7 }
 0x747   :  { %v570_v18 = vsel %vm254_vm4, %v569_v16, 0.0 }
 0x748   :  { %v571_v19 = vrot.slane %v570_v18, 4  ;;  %v378_v20 = vsel %vm254_vm4, %v377_v17, 0.0 }
 0x749   :  { %v379_v21 = vrot.slane %v378_v20, 4 }
 0x74a   :  { %v572_v22 = vadd.f32 %v571_v19, %v570_v18 }
 0x74b   :  { %v380_v23 = vadd.f32 %v379_v21, %v378_v20 }
 0x74c   :  { %v573_v24 = vrot.slane %v572_v22, 2 }
 0x74d   :  { %v381_v25 = vrot.slane %v380_v23, 2 }
 0x74e   :  { %v574_v26 = vadd.f32 %v573_v24, %v572_v22 }
 0x74f   :  { %v382_v27 = vadd.f32 %v381_v25, %v380_v23 }
 0x750   :  { %v575_v28 = vrot.slane %v574_v26, 1 }
 0x751   :  { %v383_v29 = vrot.slane %v382_v27, 1 }
 0x752   :  { %v576_v30 = vadd.f32 %v575_v28, %v574_v26 }
 0x753   :  { %v384_v31 = vadd.f32 %v383_v29, %v382_v27 }
 0x754   :  { %783 = vrcp.f32 %v576_v30 }
 0x755   :  { %785 = vrcp.f32 %v384_v31 }
 0x75e   :  { %v784_v32 = vpop.eup %783 }
 0x75f   :  { %v786_v33 = vpop.eup %785  ;;  %v578_v34 = vmul.f32 0.0625, %v784_v32 }
 0x760   :  { %v386_v35 = vmul.f32 0.0625, %v786_v33 }
 0x761   :  { %v579_v38 = vmul.f32 %v578_v34, %v569_v16 }
 0x762   :  { %v387_v39 = vmul.f32 %v386_v35, %v377_v17 }
 0x763   :  { %v580_v40 = vsel %vm254_vm4, %v579_v38, 0.0 }
 0x764   :  { %581 = vadd.xlane.f32.xlu1 %v580_v40  ;;  %v388_v41 = vsel %vm254_vm4, %v387_v39, 0.0 }
 0x765   :  { %389 = vadd.xlane.f32.xlu0 %v388_v41  ;;  %v640_v41 = vmul.f32 14.285714, %v959_v36 }
 0x7f1   :  { %v582_v42 = vpop.xlane.xlu1 %581 }
 0x7f2   :  { %787 = vrcp.f32 %v582_v42  ;;  %v390_v43 = vpop.xlane.xlu0 %389 }
 0x7f3   :  { %789 = vrcp.f32 %v390_v43  ;;  %v641_v43 = vsel %vm254_vm4, %v640_v41, -inf }
 0x7fc   :  { %v788_v44 = vpop.eup %787 }
 0x7fd   :  { %v790_v45 = vpop.eup %789  ;;  %v584_v46 = vmul.f32 0.5, %v788_v44 }
 0x7fe   :  { %v392_v47 = vmul.f32 0.5, %v790_v45 }
 0x7ff   :  { %v585_v48 = vmul.f32 %v584_v46, %v579_v38 }
 0x800   :  { %v393_v49 = vmul.f32 %v392_v47, %v387_v39  ;;  %v653_v39 = vmul.f32 14.285714, %v961_v37 }
 0x801   :  { %v586_v50 = vsel %vm254_vm4, %v585_v48, 0.0 }
 0x802   :  { %v587_v51 = vrot.slane %v586_v50, 4  ;;  %v394_v52 = vsel %vm254_vm4, %v393_v49, 0.0  ;;  %v654_v42 = vsel %vm254_vm4, %v653_v39, -inf }
 0x803   :  { %v395_v53 = vrot.slane %v394_v52, 4 }
 0x804   :  { %v588_v54 = vadd.f32 %v587_v51, %v586_v50 }
 0x805   :  { %v396_v55 = vadd.f32 %v395_v53, %v394_v52 }
 0x806   :  { %v589_v56 = vrot.slane %v588_v54, 2 }
 0x807   :  { %v397_v57 = vrot.slane %v396_v55, 2 }
 0x808   :  { %v590_v58 = vadd.f32 %v589_v56, %v588_v54 }
 0x809   :  { %v398_v59 = vadd.f32 %v397_v57, %v396_v55 }
 0x80a   :  { %v591_v60 = vrot.slane %v590_v58, 1 }
 0x80b   :  { %v399_v61 = vrot.slane %v398_v59, 1 }
 0x80c   :  { %v592_v62 = vadd.f32 %v591_v60, %v590_v58 }
 0x80d   :  { %v400_v63 = vadd.f32 %v399_v61, %v398_v59 }
 0x80e   :  { %791 = vrcp.f32 %v592_v62 }
 0x80f   :  { %793 = vrcp.f32 %v400_v63 }
 0x818   :  { %v792_v0 = vpop.eup %791 }
 0x819   :  { %v794_v1 = vpop.eup %793  ;;  %v594_v2 = vmul.f32 0.0625, %v792_v0 }
 0x81a   :  { %v402_v3 = vmul.f32 0.0625, %v794_v1 }
 0x81b   :  { %v595_v4 = vmul.f32 %v594_v2, %v585_v48 }
 0x81c   :  { %v403_v5 = vmul.f32 %v402_v3, %v393_v49 }
 0x81d   :  { %v596_v6 = vsel %vm254_vm4, %v595_v4, 0.0 }
 0x81e   :  { %597 = vadd.xlane.f32.xlu1 %v596_v6  ;;  %v404_v7 = vsel %vm254_vm4, %v403_v5, 0.0 }
 0x81f   :  { %405 = vadd.xlane.f32.xlu0 %v404_v7 }
 0x8ab   :  { %v598_v8 = vpop.xlane.xlu1 %597 }
 0x8ac   :  { %795 = vrcp.f32 %v598_v8  ;;  %v406_v9 = vpop.xlane.xlu0 %405 }
 0x8ad   :  { %797 = vrcp.f32 %v406_v9 }
 0x8b6   :  { %v796_v10 = vpop.eup %795 }
 0x8b7   :  { %v798_v11 = vpop.eup %797  ;;  %v600_v12 = vmul.f32 0.5, %v796_v10 }
 0x8b8   :  { %v408_v13 = vmul.f32 0.5, %v798_v11 }
 0x8b9   :  { %v601_v14 = vmul.f32 %v600_v12, %v595_v4 }
 0x8ba   :  { %v409_v15 = vmul.f32 %v408_v13, %v403_v5 }
 0x8bb   :  { %v602_v16 = vsel %vm254_vm4, %v601_v14, 0.0 }
 0x8bc   :  { %v603_v17 = vrot.slane %v602_v16, 4  ;;  %v410_v18 = vsel %vm254_vm4, %v409_v15, 0.0 }
 0x8bd   :  { %v411_v19 = vrot.slane %v410_v18, 4 }
 0x8be   :  { %v604_v20 = vadd.f32 %v603_v17, %v602_v16 }
 0x8bf   :  { %v412_v21 = vadd.f32 %v411_v19, %v410_v18 }
 0x8c0   :  { %v605_v22 = vrot.slane %v604_v20, 2 }
 0x8c1   :  { %v413_v23 = vrot.slane %v412_v21, 2 }
 0x8c2   :  { %v606_v24 = vadd.f32 %v605_v22, %v604_v20 }
 0x8c3   :  { %v414_v25 = vadd.f32 %v413_v23, %v412_v21 }
 0x8c4   :  { %v607_v26 = vrot.slane %v606_v24, 1 }
 0x8c5   :  { %v415_v27 = vrot.slane %v414_v25, 1 }
 0x8c6   :  { %v608_v28 = vadd.f32 %v607_v26, %v606_v24 }
 0x8c7   :  { %v416_v29 = vadd.f32 %v415_v27, %v414_v25 }
 0x8c8   :  { %799 = vrcp.f32 %v608_v28 }
 0x8c9   :  { %801 = vrcp.f32 %v416_v29 }
 0x8d2   :  { %v800_v30 = vpop.eup %799 }
 0x8d3   :  { %v802_v31 = vpop.eup %801  ;;  %v610_v32 = vmul.f32 0.0625, %v800_v30 }
 0x8d4   :  { %v418_v33 = vmul.f32 0.0625, %v802_v31 }
 0x8d5   :  { %v611_v34 = vmul.f32 %v610_v32, %v601_v14 }
 0x8d6   :  { %v419_v35 = vmul.f32 %v418_v33, %v409_v15 }
 0x8d7   :  { %v612_v38 = vsel %vm254_vm4, %v611_v34, 0.0 }
 0x8d8   :  { %613 = vadd.xlane.f32.xlu1 %v612_v38  ;;  %v420_v40 = vsel %vm254_vm4, %v419_v35, 0.0 }
 0x8d9   :  { %421 = vadd.xlane.f32.xlu0 %v420_v40 }
 0x8dc   :  { %655 = vmax.xlane.f32.xlu1 %v654_v42 }
 0x8dd   :  { %642 = vmax.xlane.f32.xlu0 %v641_v43 }
 0x965   :  { %v614_v44 = vpop.xlane.xlu1 %613 }
 0x966   :  { %803 = vrcp.f32 %v614_v44  ;;  %v422_v45 = vpop.xlane.xlu0 %421 }
 0x967   :  { %805 = vrcp.f32 %v422_v45 }
 0x969   :  { %v656_v0 = vpop.xlane.xlu1 %655 }
 0x96a   :  { %v643_v1 = vpop.xlane.xlu0 %642  ;;  %v657_v2 = vsub.f32 %v653_v39, %v656_v0 }
 0x96b   :  { %v644_v3 = vsub.f32 %v640_v41, %v643_v1 }
 0x96c   :  { %v658_v4 = vmul.f32 1.442695, %v657_v2 }
 0x96d   :  { %v645_v5 = vmul.f32 1.442695, %v644_v3 }
 0x970   :  { %v804_v46 = vpop.eup %803 }
 0x971   :  { %v806_v47 = vpop.eup %805  ;;  %v616_v48 = vmul.f32 0.5, %v804_v46 }
 0x972   :  { %v424_v37 = vmul.f32 0.5, %v806_v47 }
 0x973   :  { %v617_v49 = vmul.f32 %v616_v48, %v611_v34 }
 0x974   :  { %v425_v50 = vmul.f32 %v424_v37, %v419_v35 }
 0x975   :  { %v618_v51 = vsel %vm254_vm4, %v617_v49, 0.0 }
 0x976   :  { %v619_v36 = vrot.slane %v618_v51, 4  ;;  %v426_v52 = vsel %vm254_vm4, %v425_v50, 0.0 }
 0x977   :  { %v427_v53 = vrot.slane %v426_v52, 4 }
 0x978   :  { %v620_v54 = vadd.f32 %v619_v36, %v618_v51 }
 0x979   :  { %v428_v55 = vadd.f32 %v427_v53, %v426_v52 }
 0x97a   :  { %v621_v56 = vrot.slane %v620_v54, 2 }
 0x97b   :  { %v429_v57 = vrot.slane %v428_v55, 2 }
 0x97c   :  { %v622_v58 = vadd.f32 %v621_v56, %v620_v54 }
 0x97d   :  { %v430_v59 = vadd.f32 %v429_v57, %v428_v55 }
 0x97e   :  { %v623_v60 = vrot.slane %v622_v58, 1 }
 0x97f   :  { %v431_v61 = vrot.slane %v430_v59, 1 }
 0x980   :  { %v624_v62 = vadd.f32 %v623_v60, %v622_v58 }
 0x981   :  { %v432_v63 = vadd.f32 %v431_v61, %v430_v59 }
 0x982   :  { %807 = vrcp.f32 %v624_v62 }
 0x983   :  { %809 = vrcp.f32 %v432_v63 }
 0x984   :  { %811 = vpow2.f32 %v658_v4 }
 0x985   :  { %813 = vpow2.f32 %v645_v5 }
 0x98c   :  { %v808_v6 = vpop.eup %807 }
 0x98d   :  { %v810_v7 = vpop.eup %809  ;;  %v626_v8 = vmul.f32 %v808_v6, %v624_v62 }
 0x98e   :  { %v434_v9 = vmul.f32 %v810_v7, %v432_v63  ;;  %v812_v19 = vpop.eup %811 }
 0x98f   :  { %v627_v10 = vsub.f32 2.0, %v626_v8  ;;  %v814_v21 = vpop.eup %813  ;;  %v660_v22 = vsel %vm254_vm4, %v812_v19, 0.0 }
 0x990   :  { %v435_v11 = vsub.f32 2.0, %v434_v9  ;;  %v647_v23 = vsel %vm254_vm4, %v814_v21, 0.0 }
 0x991   :  { %v628_v12 = vmul.f32 %v808_v6, %v627_v10 }
 0x992   :  { %v436_v13 = vmul.f32 %v810_v7, %v435_v11 }
 0x993   :  { %v629_v14 = vmul.f32 0.0625, %v628_v12 }
 0x994   :  { %v437_v15 = vmul.f32 0.0625, %v436_v13 }
 0x995   :  { %v630_v16 = vmul.f32 %v629_v14, %v617_v49 }
 0x996   :  { %v438_v17 = vmul.f32 %v437_v15, %v425_v50 }
 0x997   :  { %v631_v18 = vsel %vm254_vm4, %v630_v16, 0.0 }
 0x998   :  { %632 = vadd.xlane.f32.xlu1 %v631_v18  ;;  %v439_v20 = vsel %vm254_vm4, %v438_v17, 0.0 }
 0x999   :  { %440 = vadd.xlane.f32.xlu0 %v439_v20 }
 0x99c   :  { %661 = vadd.xlane.f32.xlu1 %v660_v22 }
 0x99d   :  { %648 = vadd.xlane.f32.xlu0 %v647_v23 }
 0xa25   :  { %v633_v24 = vpop.xlane.xlu1 %632 }
 0xa26   :  { %815 = vrcp.f32 %v633_v24  ;;  %v441_v25 = vpop.xlane.xlu0 %440 }
 0xa27   :  { %817 = vrcp.f32 %v441_v25 }
 0xa29   :  { %v662_v26 = vpop.xlane.xlu1 %661 }
 0xa2a   :  { %819 = vlog2.f32 %v662_v26  ;;  %v649_v27 = vpop.xlane.xlu0 %648 }
 0xa2b   :  { %821 = vlog2.f32 %v649_v27 }
 0xa30   :  { %v816_v28 = vpop.eup %815 }
 0xa31   :  { %v818_v29 = vpop.eup %817  ;;  %v635_v30 = vmul.f32 %v816_v28, %v633_v24 }
 0xa32   :  { %v443_v31 = vmul.f32 %v818_v29, %v441_v25 }
 0xa33   :  { %v636_v32 = vsub.f32 2.0, %v635_v30 }
 0xa34   :  { %v820_v33 = vpop.eup %819  ;;  %v444_v34 = vsub.f32 2.0, %v443_v31 }
 0xa35   :  { %v822_v35 = vpop.eup %821  ;;  %v637_v38 = vmul.f32 %v816_v28, %v636_v32  ;;  %v664_v40 = vmul.f32 0.6931472, %v820_v33 }
 0xa36   :  { %v445_v39 = vmul.f32 %v818_v29, %v444_v34  ;;  %v651_v41 = vmul.f32 0.6931472, %v822_v35 }
 0xa37   :  { %v638_v42 = vmul.f32 0.5, %v637_v38  ;;  %v665_v46 = vsub.f32 %v657_v2, %v664_v40 }
 0xa38   :  { %v446_v43 = vmul.f32 0.5, %v445_v39  ;;  %v652_v44 = vsub.f32 %v644_v3, %v651_v41 }
 0xa39   :  { %v639_v45 = vmul.f32 %v638_v42, %v630_v16 }
 0xa3a   :  { %v447_v47 = vmul.f32 %v446_v43, %v438_v17 }
 0xa3b   :  { %v667_v48 = vmul.f32 %v652_v44, %v639_v45 }
 0xa3c   :  { %v666_v37 = vmul.f32 %v665_v46, %v447_v47 }
 0xa3e   :  { %v668_v49 = vadd.f32 %v667_v48, %v666_v37 }
 0xa40   :  { %v669_v50 = vsel %vm254_vm4, %v668_v49, 0.0 }
 0xa41   :  { %670 = vadd.xlane.f32.xlu0 %v669_v50 }
 0xace   :  { %v671_v51 = vpop.xlane.xlu0 %670 }
 0xacf   :  { %v672_v36 = vsel %vm258_vm5, %v671_v51, 0.0 }
 0xad0   :  { %v673_v52 = vrot.slane %v672_v36, 4 }
 0xad2   :  { %v674_v53 = vadd.f32 %v673_v52, %v672_v36 }
 0xad4   :  { %v675_v54 = vrot.slane %v674_v53, 2 }
 0xad6   :  { %v676_v55 = vadd.f32 %v675_v54, %v674_v53 }
 0xad8   :  { %v677_v56 = vrot.slane %v676_v55, 1 }
 0xada   :  { %v678_v57 = vadd.f32 %v677_v56, %v676_v55 }
 0xadc   :  { %v679_v58 = vmul.f32 -0.5, %v678_v57 }
 0xade   :  { %681 = vst.msk [vmem:[#allocation7] sm:$0x1] %vm680_vm6, %v679_v58 }
 0xadf   :  { %878 = shalt.err (!%p875_p6)
}
 0xae0   :  { %s879_s16 = scalar_lea.hbm %s1038_s3, 16 }
 0xae1   :  { %p880_p7 = scmp.ne.s32.totalorder %s1038_s3, %s879_s16  ;;  %p883_p8 = scmp.lt.u32.totalorder %s879_s16, %s1038_s3 }
 0xae3   :  { %p885_p9 = pnand %p883_p8, %p880_p7 }
 0xae5   :  { %888 = shalt.err (!%p885_p9)
}
 0xae6   :  { %691 = dma.vmem_to_hbm [thread:$0]  %s689_s11, 16, %s1038_s3, [#allocation4]  }
 0xae7   :  { %893 = dma.done.wait [#allocation4], 16  }
 0xae8   :  { %894 = vsyncadd [#allocation4], 4294967280 }
 0xae9   :  { %695 = vsyncpa [#allocation3], 1 }
 0xaea   :  { %696 = vsyncpa [#allocation6], 1 }
 0xaeb   :  { %697 = vsyncpa [#allocation4], 1 }

</bundles_post_ra>
